<compile_context>
chip_gen: v6e
topology: v6e:2x2x1
jax: 0.10.0
libtpu: 0.0.40
codegen_flags: <defaults>
</compile_context>

<pallas_src>
import functools
import math

import jax
import jax.numpy as jnp
from jax import lax
from jax.experimental import pallas as pl
from jax.experimental.pallas import tpu as pltpu

EPS = 1e-5


# ------------------------------ kernel body -------------------------------- #

def _mha(q, k, v, wo, bo, n_heads):
    """Multi-head attention on 2-D (S, D) tiles; heads statically unrolled.

    The 1/sqrt(dk) score scale is already folded into the Q projection.
    """
    S, D = q.shape
    dk = D // n_heads
    head_outs = []
    for h in range(n_heads):
        lo, hi = h * dk, (h + 1) * dk
        qh = q[:, lo:hi]                                    # (S,  dk)
        kh = k[:, lo:hi]                                    # (Sk, dk)
        vh = v[:, lo:hi]                                    # (Sk, dk)
        # scores = qh @ kh.T without materializing a transpose
        s = lax.dot_general(qh, kh, (((1,), (1,)), ((), ())),
                            preferred_element_type=jnp.float32)  # (S, Sk)
        m = jnp.max(s, axis=-1, keepdims=True)
        p = jnp.exp(s - m)
        denom = jnp.sum(p, axis=-1, keepdims=True)
        p = p * pl.reciprocal(denom, approx=True)           # EUP, ~free slot
        head_outs.append(jnp.dot(p, vh,
                                 preferred_element_type=jnp.float32))
    o = jnp.concatenate(head_outs, axis=-1)                 # (S, D)
    return jnp.dot(o, wo, preferred_element_type=jnp.float32) + bo


def decoder_layer_kernel(x_ref, m_ref,
                         w_qkv_ref, b_qkv_ref, wo_s_ref, bo_s_ref,
                         wq_c_ref, bq_c_ref, w_kv_ref, b_kv_ref,
                         wo_c_ref, bo_c_ref,
                         w1_ref, b1_ref, w2_ref, b2_ref,
                         bn_scale_ref, bn_shift_ref,
                         out_ref, *, n_heads):
    x = x_ref[...]                                  # (S, D)   batch dim squeezed
    mem = m_ref[...]                                # (Sm, D)
    D = x.shape[1]

    # ---- sublayer 0: BN (eval affine) -> self-attention -> residual ----
    xn0 = x * bn_scale_ref[0:1, :] + bn_shift_ref[0:1, :]
    qkv = jnp.dot(xn0, w_qkv_ref[...],
                  preferred_element_type=jnp.float32) + b_qkv_ref[...]
    q, k, v = qkv[:, :D], qkv[:, D:2 * D], qkv[:, 2 * D:]
    x1 = xn0 + _mha(q, k, v, wo_s_ref[...], bo_s_ref[...], n_heads)

    # ---- sublayer 1: BN -> cross-attention over memory -> residual ----
    xn1 = x1 * bn_scale_ref[1:2, :] + bn_shift_ref[1:2, :]
    q = jnp.dot(xn1, wq_c_ref[...],
                preferred_element_type=jnp.float32) + bq_c_ref[...]
    kv = jnp.dot(mem, w_kv_ref[...],
                 preferred_element_type=jnp.float32) + b_kv_ref[...]
    k, v = kv[:, :D], kv[:, D:]
    x2 = xn1 + _mha(q, k, v, wo_c_ref[...], bo_c_ref[...], n_heads)

    # ---- sublayer 2: BN -> position-wise FFN -> residual ----
    xn2 = x2 * bn_scale_ref[2:3, :] + bn_shift_ref[2:3, :]
    h = jnp.dot(xn2, w1_ref[...],
                preferred_element_type=jnp.float32) + b1_ref[...]
    h = jnp.maximum(h, 0.0)
    out_ref[...] = xn2 + (jnp.dot(h, w2_ref[...],
                                  preferred_element_type=jnp.float32)
                          + b2_ref[...])


# ----------------------- one-time parameter fusion -------------------------- #

def _bn_affine(bn):
    scale = bn["gamma"] / jnp.sqrt(bn["var"] + EPS)
    shift = bn["beta"] - bn["mean"] * scale
    return scale, shift


def prepare_fused_params(params, n_heads):
    """Fold BN affine, QKV concat and 1/sqrt(dk) scale once, outside hot path."""
    D = params["self_attn"]["wq"].shape[0]
    dk = D // n_heads
    inv = jnp.float32(1.0 / math.sqrt(dk))

    sa = params["self_attn"]
    ca = params["src_attn"]
    s0, h0 = _bn_affine(params["bn0"])
    s1, h1 = _bn_affine(params["bn1"])
    s2, h2 = _bn_affine(params["bn2"])

    return dict(
        # self-attn: merged QKV, score scale folded into wq/bq
        w_qkv=jnp.concatenate([sa["wq"] * inv, sa["wk"], sa["wv"]], axis=1),
        b_qkv=jnp.concatenate([sa["bq"] * inv, sa["bk"], sa["bv"]], axis=1),
        wo_s=sa["wo"], bo_s=sa["bo"],
        # cross-attn: Q (scaled), merged KV over memory
        wq_c=ca["wq"] * inv, bq_c=ca["bq"] * inv,
        w_kv_c=jnp.concatenate([ca["wk"], ca["wv"]], axis=1),
        b_kv_c=jnp.concatenate([ca["bk"], ca["bv"]], axis=1),
        wo_c=ca["wo"], bo_c=ca["bo"],
        # FFN
        w1=params["ffn"]["w1"], b1=params["ffn"]["b1"],
        w2=params["ffn"]["w2"], b2=params["ffn"]["b2"],
        # BatchNorm (eval) affine, stacked: row i = sublayer i
        bn_scale=jnp.stack([s0, s1, s2]),
        bn_shift=jnp.stack([h0, h1, h2]),
    )


# -------------------------------- wrapper ----------------------------------- #

def decoder_layer_forward(fused, x, memory, pointcloud=None, *, n_heads=4):
    """Single fused pallas_call for the whole decoder layer."""
    del pointcloud  # mask slot; None in the reference DCP forward
    B, S, D = x.shape
    Sm = memory.shape[1]
    F = fused["w1"].shape[1]

    def full(shape):
        n = len(shape)
        return pl.BlockSpec(shape, lambda b, n=n: (0,) * n)

    kernel = functools.partial(decoder_layer_kernel, n_heads=n_heads)
    return pl.pallas_call(
        kernel,
        out_shape=jax.ShapeDtypeStruct((B, S, D), jnp.float32),
        grid=(B,),
        in_specs=[
            pl.BlockSpec((None, S, D), lambda b: (b, 0, 0)),    # x     -> (S, D)
            pl.BlockSpec((None, Sm, D), lambda b: (b, 0, 0)),   # mem   -> (Sm, D)
            full((D, 3 * D)), full((1, 3 * D)),                 # w_qkv, b_qkv
            full((D, D)), full((1, D)),                         # wo_s, bo_s
            full((D, D)), full((1, D)),                         # wq_c, bq_c
            full((D, 2 * D)), full((1, 2 * D)),                 # w_kv_c, b_kv_c
            full((D, D)), full((1, D)),                         # wo_c, bo_c
            full((D, F)), full((1, F)),                         # w1, b1
            full((F, D)), full((1, D)),                         # w2, b2
            full((3, D)), full((3, D)),                         # bn_scale, bn_shift
        ],
        out_specs=pl.BlockSpec((None, S, D), lambda b: (b, 0, 0)),
        compiler_params=pltpu.CompilerParams(
            dimension_semantics=("parallel",)),
    )(x, memory,
      fused["w_qkv"], fused["b_qkv"], fused["wo_s"], fused["bo_s"],
      fused["wq_c"], fused["bq_c"], fused["w_kv_c"], fused["b_kv_c"],
      fused["wo_c"], fused["bo_c"],
      fused["w1"], fused["b1"], fused["w2"], fused["b2"],
      fused["bn_scale"], fused["bn_shift"])


# ------------------------- deterministic params ----------------------------- #

def _linear(key, fan_in, fan_out):
    kw, kb = jax.random.split(key)
    w = jax.random.normal(kw, (fan_in, fan_out), jnp.float32) / math.sqrt(fan_in)
    b = 0.01 * jax.random.normal(kb, (1, fan_out), jnp.float32)
    return w, b


def _attn_params(key, D):
    k = jax.random.split(key, 4)
    wq, bq = _linear(k[0], D, D)
    wk, bk = _linear(k[1], D, D)
    wv, bv = _linear(k[2], D, D)
    wo, bo = _linear(k[3], D, D)
    return dict(wq=wq, bq=bq, wk=wk, bk=bk, wv=wv, bv=bv, wo=wo, bo=bo)


def _bn_params(key, D):
    k = jax.random.split(key, 4)
    return dict(
        gamma=1.0 + 0.1 * jax.random.normal(k[0], (D,), jnp.float32),
        beta=0.1 * jax.random.normal(k[1], (D,), jnp.float32),
        mean=0.1 * jax.random.normal(k[2], (D,), jnp.float32),
        var=1.0 + 0.1 * jnp.abs(jax.random.normal(k[3], (D,), jnp.float32)),
    )


def make_params(key, D, F):
    k = jax.random.split(key, 7)
    ffw1, ffb1 = _linear(k[2], D, F)
    ffw2, ffb2 = _linear(k[3], F, D)
    return dict(
        self_attn=_attn_params(k[0], D),
        src_attn=_attn_params(k[1], D),
        ffn=dict(w1=ffw1, b1=ffb1, w2=ffw2, b2=ffb2),
        bn0=_bn_params(k[4], D),
        bn1=_bn_params(k[5], D),
        bn2=_bn_params(k[6], D),
    )


# --------------------------- pure-JAX reference ------------------------------ #

def _ref_mha(q_in, k_in, v_in, p, n_heads):
    B, S, D = q_in.shape
    dk = D // n_heads
    q = q_in @ p["wq"] + p["bq"]
    k = k_in @ p["wk"] + p["bk"]
    v = v_in @ p["wv"] + p["bv"]
    q = q.reshape(B, -1, n_heads, dk).transpose(0, 2, 1, 3)
    k = k.reshape(B, -1, n_heads, dk).transpose(0, 2, 1, 3)
    v = v.reshape(B, -1, n_heads, dk).transpose(0, 2, 1, 3)
    s = jnp.einsum("bhqd,bhkd->bhqk", q, k) / math.sqrt(dk)
    p_attn = jax.nn.softmax(s, axis=-1)
    o = jnp.einsum("bhqk,bhkd->bhqd", p_attn, v)
    o = o.transpose(0, 2, 1, 3).reshape(B, -1, D)
    return o @ p["wo"] + p["bo"]


def reference_forward(params, x, memory, n_heads=4):
    def bn(x, b):
        scale = b["gamma"] / jnp.sqrt(b["var"] + EPS)
        return x * scale + (b["beta"] - b["mean"] * scale)

    xn = bn(x, params["bn0"])
    x = xn + _ref_mha(xn, xn, xn, params["self_attn"], n_heads)
    xn = bn(x, params["bn1"])
    x = xn + _ref_mha(xn, memory, memory, params["src_attn"], n_heads)
    xn = bn(x, params["bn2"])
    h = jnp.maximum(xn @ params["ffn"]["w1"] + params["ffn"]["b1"], 0.0)
    return xn + (h @ params["ffn"]["w2"] + params["ffn"]["b2"])


# ----------------------------------- main ------------------------------------ #

if __name__ == "__main__":
    B, S, D, F, H = 2, 8, 32, 64, 4

    key = jax.random.PRNGKey(0)
    kp, kx, km, kpc = jax.random.split(key, 4)
    params = make_params(kp, D, F)
    x = jax.random.normal(kx, (B, S, D), jnp.float32)
    memory = jax.random.normal(km, (B, S, D), jnp.float32)
    pointcloud = jax.random.normal(kpc, (B, 3, 16), jnp.float32)  # unused (mask=None)

    # One-time parameter fusion (BN affine, QKV merge, score-scale folding).
    fused = prepare_fused_params(params, H)

    out = decoder_layer_forward(fused, x, memory, pointcloud, n_heads=H)
    out = jax.block_until_ready(out)

    ref = reference_forward(params, x, memory, n_heads=H)
    assert out.shape == (B, S, D)
    # Tolerance loosened slightly vs exact math: softmax denominator uses the
    # EUP approximate reciprocal (pl.reciprocal(approx=True)).
    assert jnp.allclose(out, ref, atol=5e-3, rtol=5e-3), "mismatch vs reference"

    print("KERNEL_OK")
</pallas_src>

<mosaic_0001>
module attributes {stable_mosaic.version = 11 : i64} {
  func.func @decoder_layer_kernel(%arg0: i32, %arg1: memref<1x8x32xf32, #tpu.memory_space<vmem>>, %arg2: memref<1x8x32xf32, #tpu.memory_space<vmem>>, %arg3: memref<32x96xf32, #tpu.memory_space<vmem>>, %arg4: memref<1x96xf32, #tpu.memory_space<vmem>>, %arg5: memref<32x32xf32, #tpu.memory_space<vmem>>, %arg6: memref<1x32xf32, #tpu.memory_space<vmem>>, %arg7: memref<32x32xf32, #tpu.memory_space<vmem>>, %arg8: memref<1x32xf32, #tpu.memory_space<vmem>>, %arg9: memref<32x64xf32, #tpu.memory_space<vmem>>, %arg10: memref<1x64xf32, #tpu.memory_space<vmem>>, %arg11: memref<32x32xf32, #tpu.memory_space<vmem>>, %arg12: memref<1x32xf32, #tpu.memory_space<vmem>>, %arg13: memref<32x64xf32, #tpu.memory_space<vmem>>, %arg14: memref<1x64xf32, #tpu.memory_space<vmem>>, %arg15: memref<64x32xf32, #tpu.memory_space<vmem>>, %arg16: memref<1x32xf32, #tpu.memory_space<vmem>>, %arg17: memref<3x32xf32, #tpu.memory_space<vmem>>, %arg18: memref<3x32xf32, #tpu.memory_space<vmem>>, %arg19: memref<1x8x32xf32, #tpu.memory_space<vmem>>) attributes {dimension_semantics = [#tpu.dimension_semantics<parallel>], iteration_bounds = array<i64: 2>, scalar_prefetch = 0 : i64, scratch_operands = 0 : i64, tpu.core_type = #tpu.core_type<tc>, window_params = [{transform_indices = @transform_0, window_bounds = array<i64: 1, 8, 32>}, {transform_indices = @transform_1, window_bounds = array<i64: 1, 8, 32>}, {pipeline_mode = #tpu.pipeline_mode<synchronous>, transform_indices = @transform_2, window_bounds = array<i64: 32, 96>}, {pipeline_mode = #tpu.pipeline_mode<synchronous>, transform_indices = @transform_3, window_bounds = array<i64: 1, 96>}, {pipeline_mode = #tpu.pipeline_mode<synchronous>, transform_indices = @transform_4, window_bounds = array<i64: 32, 32>}, {pipeline_mode = #tpu.pipeline_mode<synchronous>, transform_indices = @transform_5, window_bounds = array<i64: 1, 32>}, {pipeline_mode = #tpu.pipeline_mode<synchronous>, transform_indices = @transform_6, window_bounds = array<i64: 32, 32>}, {pipeline_mode = #tpu.pipeline_mode<synchronous>, transform_indices = @transform_7, window_bounds = array<i64: 1, 32>}, {pipeline_mode = #tpu.pipeline_mode<synchronous>, transform_indices = @transform_8, window_bounds = array<i64: 32, 64>}, {pipeline_mode = #tpu.pipeline_mode<synchronous>, transform_indices = @transform_9, window_bounds = array<i64: 1, 64>}, {pipeline_mode = #tpu.pipeline_mode<synchronous>, transform_indices = @transform_10, window_bounds = array<i64: 32, 32>}, {pipeline_mode = #tpu.pipeline_mode<synchronous>, transform_indices = @transform_11, window_bounds = array<i64: 1, 32>}, {pipeline_mode = #tpu.pipeline_mode<synchronous>, transform_indices = @transform_12, window_bounds = array<i64: 32, 64>}, {pipeline_mode = #tpu.pipeline_mode<synchronous>, transform_indices = @transform_13, window_bounds = array<i64: 1, 64>}, {pipeline_mode = #tpu.pipeline_mode<synchronous>, transform_indices = @transform_14, window_bounds = array<i64: 64, 32>}, {pipeline_mode = #tpu.pipeline_mode<synchronous>, transform_indices = @transform_15, window_bounds = array<i64: 1, 32>}, {pipeline_mode = #tpu.pipeline_mode<synchronous>, transform_indices = @transform_16, window_bounds = array<i64: 3, 32>}, {pipeline_mode = #tpu.pipeline_mode<synchronous>, transform_indices = @transform_17, window_bounds = array<i64: 3, 32>}, {transform_indices = @transform_18, window_bounds = array<i64: 1, 8, 32>}]} {
    %c0 = arith.constant 0 : index
    %c0_0 = arith.constant 0 : index
    %c0_1 = arith.constant 0 : index
    %0 = vector.load %arg1[%c0, %c0_0, %c0_1] : memref<1x8x32xf32, #tpu.memory_space<vmem>>, vector<1x8x32xf32>
    %1 = vector.shape_cast %0 : vector<1x8x32xf32> to vector<8x32xf32>
    %c0_2 = arith.constant 0 : index
    %c0_3 = arith.constant 0 : index
    %c0_4 = arith.constant 0 : index
    %2 = vector.load %arg2[%c0_2, %c0_3, %c0_4] : memref<1x8x32xf32, #tpu.memory_space<vmem>>, vector<1x8x32xf32>
    %3 = vector.shape_cast %2 : vector<1x8x32xf32> to vector<8x32xf32>
    %c0_5 = arith.constant 0 : index
    %c0_6 = arith.constant 0 : index
    %4 = vector.load %arg17[%c0_5, %c0_6] : memref<3x32xf32, #tpu.memory_space<vmem>>, vector<1x32xf32>
    %5 = vector.broadcast %4 : vector<1x32xf32> to vector<8x32xf32>
    %6 = arith.mulf %1, %5 : vector<8x32xf32>
    %c0_7 = arith.constant 0 : index
    %c0_8 = arith.constant 0 : index
    %7 = vector.load %arg18[%c0_7, %c0_8] : memref<3x32xf32, #tpu.memory_space<vmem>>, vector<1x32xf32>
    %8 = vector.broadcast %7 : vector<1x32xf32> to vector<8x32xf32>
    %9 = arith.addf %6, %8 : vector<8x32xf32>
    %c0_9 = arith.constant 0 : index
    %c0_10 = arith.constant 0 : index
    %10 = vector.load %arg3[%c0_9, %c0_10] : memref<32x96xf32, #tpu.memory_space<vmem>>, vector<32x96xf32>
    %cst = arith.constant dense<0.000000e+00> : vector<8x96xf32>
    %11 = tpu.matmul %9, %10, %cst {dimension_numbers = #tpu.dot_dimension_numbers<[1], [0], [0], [1], [0, 0, 1, 1], [], []>} : vector<8x32xf32>, vector<32x96xf32>, vector<8x96xf32> -> vector<8x96xf32>
    %c0_11 = arith.constant 0 : index
    %c0_12 = arith.constant 0 : index
    %12 = vector.load %arg4[%c0_11, %c0_12] : memref<1x96xf32, #tpu.memory_space<vmem>>, vector<1x96xf32>
    %13 = vector.broadcast %12 : vector<1x96xf32> to vector<8x96xf32>
    %14 = arith.addf %11, %13 : vector<8x96xf32>
    %15 = vector.extract_strided_slice %14 {offsets = [0, 0], sizes = [8, 32], strides = [1, 1]} : vector<8x96xf32> to vector<8x32xf32>
    %16 = vector.extract_strided_slice %14 {offsets = [0, 32], sizes = [8, 32], strides = [1, 1]} : vector<8x96xf32> to vector<8x32xf32>
    %17 = vector.extract_strided_slice %14 {offsets = [0, 64], sizes = [8, 32], strides = [1, 1]} : vector<8x96xf32> to vector<8x32xf32>
    %c0_13 = arith.constant 0 : index
    %c0_14 = arith.constant 0 : index
    %18 = vector.load %arg5[%c0_13, %c0_14] : memref<32x32xf32, #tpu.memory_space<vmem>>, vector<32x32xf32>
    %c0_15 = arith.constant 0 : index
    %c0_16 = arith.constant 0 : index
    %19 = vector.load %arg6[%c0_15, %c0_16] : memref<1x32xf32, #tpu.memory_space<vmem>>, vector<1x32xf32>
    %20 = vector.extract_strided_slice %15 {offsets = [0, 0], sizes = [8, 8], strides = [1, 1]} : vector<8x32xf32> to vector<8x8xf32>
    %21 = vector.extract_strided_slice %16 {offsets = [0, 0], sizes = [8, 8], strides = [1, 1]} : vector<8x32xf32> to vector<8x8xf32>
    %22 = vector.extract_strided_slice %17 {offsets = [0, 0], sizes = [8, 8], strides = [1, 1]} : vector<8x32xf32> to vector<8x8xf32>
    %cst_17 = arith.constant dense<0.000000e+00> : vector<8x8xf32>
    %23 = tpu.matmul %20, %21, %cst_17 {dimension_numbers = #tpu.dot_dimension_numbers<[1], [1], [0], [0], [0, 0, 1, 0], [], []>} : vector<8x8xf32>, vector<8x8xf32>, vector<8x8xf32> -> vector<8x8xf32>
    %cst_18 = arith.constant dense<0xFF800000> : vector<8xf32>
    %24 = vector.multi_reduction <maximumf>, %23, %cst_18 [1] : vector<8x8xf32> to vector<8xf32>
    %25 = vector.shape_cast %24 : vector<8xf32> to vector<8x1xf32>
    %26 = vector.broadcast %25 : vector<8x1xf32> to vector<8x8xf32>
    %27 = arith.subf %23, %26 : vector<8x8xf32>
    %28 = math.exp %27 : vector<8x8xf32>
    %cst_19 = arith.constant dense<0.000000e+00> : vector<8xf32>
    %29 = vector.multi_reduction <add>, %28, %cst_19 [1] : vector<8x8xf32> to vector<8xf32>
    %30 = vector.shape_cast %29 : vector<8xf32> to vector<8x1xf32>
    %31 = tpu.reciprocal %30 {approx = true} : vector<8x1xf32> -> vector<8x1xf32>
    %32 = vector.broadcast %31 : vector<8x1xf32> to vector<8x8xf32>
    %33 = arith.mulf %28, %32 : vector<8x8xf32>
    %cst_20 = arith.constant dense<0.000000e+00> : vector<8x8xf32>
    %34 = tpu.matmul %33, %22, %cst_20 {dimension_numbers = #tpu.dot_dimension_numbers<[1], [0], [0], [1], [0, 0, 1, 1], [], []>} : vector<8x8xf32>, vector<8x8xf32>, vector<8x8xf32> -> vector<8x8xf32>
    %35 = vector.extract_strided_slice %15 {offsets = [0, 8], sizes = [8, 8], strides = [1, 1]} : vector<8x32xf32> to vector<8x8xf32>
    %36 = vector.extract_strided_slice %16 {offsets = [0, 8], sizes = [8, 8], strides = [1, 1]} : vector<8x32xf32> to vector<8x8xf32>
    %37 = vector.extract_strided_slice %17 {offsets = [0, 8], sizes = [8, 8], strides = [1, 1]} : vector<8x32xf32> to vector<8x8xf32>
    %cst_21 = arith.constant dense<0.000000e+00> : vector<8x8xf32>
    %38 = tpu.matmul %35, %36, %cst_21 {dimension_numbers = #tpu.dot_dimension_numbers<[1], [1], [0], [0], [0, 0, 1, 0], [], []>} : vector<8x8xf32>, vector<8x8xf32>, vector<8x8xf32> -> vector<8x8xf32>
    %cst_22 = arith.constant dense<0xFF800000> : vector<8xf32>
    %39 = vector.multi_reduction <maximumf>, %38, %cst_22 [1] : vector<8x8xf32> to vector<8xf32>
    %40 = vector.shape_cast %39 : vector<8xf32> to vector<8x1xf32>
    %41 = vector.broadcast %40 : vector<8x1xf32> to vector<8x8xf32>
    %42 = arith.subf %38, %41 : vector<8x8xf32>
    %43 = math.exp %42 : vector<8x8xf32>
    %cst_23 = arith.constant dense<0.000000e+00> : vector<8xf32>
    %44 = vector.multi_reduction <add>, %43, %cst_23 [1] : vector<8x8xf32> to vector<8xf32>
    %45 = vector.shape_cast %44 : vector<8xf32> to vector<8x1xf32>
    %46 = tpu.reciprocal %45 {approx = true} : vector<8x1xf32> -> vector<8x1xf32>
    %47 = vector.broadcast %46 : vector<8x1xf32> to vector<8x8xf32>
    %48 = arith.mulf %43, %47 : vector<8x8xf32>
    %cst_24 = arith.constant dense<0.000000e+00> : vector<8x8xf32>
    %49 = tpu.matmul %48, %37, %cst_24 {dimension_numbers = #tpu.dot_dimension_numbers<[1], [0], [0], [1], [0, 0, 1, 1], [], []>} : vector<8x8xf32>, vector<8x8xf32>, vector<8x8xf32> -> vector<8x8xf32>
    %50 = vector.extract_strided_slice %15 {offsets = [0, 16], sizes = [8, 8], strides = [1, 1]} : vector<8x32xf32> to vector<8x8xf32>
    %51 = vector.extract_strided_slice %16 {offsets = [0, 16], sizes = [8, 8], strides = [1, 1]} : vector<8x32xf32> to vector<8x8xf32>
    %52 = vector.extract_strided_slice %17 {offsets = [0, 16], sizes = [8, 8], strides = [1, 1]} : vector<8x32xf32> to vector<8x8xf32>
    %cst_25 = arith.constant dense<0.000000e+00> : vector<8x8xf32>
    %53 = tpu.matmul %50, %51, %cst_25 {dimension_numbers = #tpu.dot_dimension_numbers<[1], [1], [0], [0], [0, 0, 1, 0], [], []>} : vector<8x8xf32>, vector<8x8xf32>, vector<8x8xf32> -> vector<8x8xf32>
    %cst_26 = arith.constant dense<0xFF800000> : vector<8xf32>
    %54 = vector.multi_reduction <maximumf>, %53, %cst_26 [1] : vector<8x8xf32> to vector<8xf32>
    %55 = vector.shape_cast %54 : vector<8xf32> to vector<8x1xf32>
    %56 = vector.broadcast %55 : vector<8x1xf32> to vector<8x8xf32>
    %57 = arith.subf %53, %56 : vector<8x8xf32>
    %58 = math.exp %57 : vector<8x8xf32>
    %cst_27 = arith.constant dense<0.000000e+00> : vector<8xf32>
    %59 = vector.multi_reduction <add>, %58, %cst_27 [1] : vector<8x8xf32> to vector<8xf32>
    %60 = vector.shape_cast %59 : vector<8xf32> to vector<8x1xf32>
    %61 = tpu.reciprocal %60 {approx = true} : vector<8x1xf32> -> vector<8x1xf32>
    %62 = vector.broadcast %61 : vector<8x1xf32> to vector<8x8xf32>
    %63 = arith.mulf %58, %62 : vector<8x8xf32>
    %cst_28 = arith.constant dense<0.000000e+00> : vector<8x8xf32>
    %64 = tpu.matmul %63, %52, %cst_28 {dimension_numbers = #tpu.dot_dimension_numbers<[1], [0], [0], [1], [0, 0, 1, 1], [], []>} : vector<8x8xf32>, vector<8x8xf32>, vector<8x8xf32> -> vector<8x8xf32>
    %65 = vector.extract_strided_slice %15 {offsets = [0, 24], sizes = [8, 8], strides = [1, 1]} : vector<8x32xf32> to vector<8x8xf32>
    %66 = vector.extract_strided_slice %16 {offsets = [0, 24], sizes = [8, 8], strides = [1, 1]} : vector<8x32xf32> to vector<8x8xf32>
    %67 = vector.extract_strided_slice %17 {offsets = [0, 24], sizes = [8, 8], strides = [1, 1]} : vector<8x32xf32> to vector<8x8xf32>
    %cst_29 = arith.constant dense<0.000000e+00> : vector<8x8xf32>
    %68 = tpu.matmul %65, %66, %cst_29 {dimension_numbers = #tpu.dot_dimension_numbers<[1], [1], [0], [0], [0, 0, 1, 0], [], []>} : vector<8x8xf32>, vector<8x8xf32>, vector<8x8xf32> -> vector<8x8xf32>
    %cst_30 = arith.constant dense<0xFF800000> : vector<8xf32>
    %69 = vector.multi_reduction <maximumf>, %68, %cst_30 [1] : vector<8x8xf32> to vector<8xf32>
    %70 = vector.shape_cast %69 : vector<8xf32> to vector<8x1xf32>
    %71 = vector.broadcast %70 : vector<8x1xf32> to vector<8x8xf32>
    %72 = arith.subf %68, %71 : vector<8x8xf32>
    %73 = math.exp %72 : vector<8x8xf32>
    %cst_31 = arith.constant dense<0.000000e+00> : vector<8xf32>
    %74 = vector.multi_reduction <add>, %73, %cst_31 [1] : vector<8x8xf32> to vector<8xf32>
    %75 = vector.shape_cast %74 : vector<8xf32> to vector<8x1xf32>
    %76 = tpu.reciprocal %75 {approx = true} : vector<8x1xf32> -> vector<8x1xf32>
    %77 = vector.broadcast %76 : vector<8x1xf32> to vector<8x8xf32>
    %78 = arith.mulf %73, %77 : vector<8x8xf32>
    %cst_32 = arith.constant dense<0.000000e+00> : vector<8x8xf32>
    %79 = tpu.matmul %78, %67, %cst_32 {dimension_numbers = #tpu.dot_dimension_numbers<[1], [0], [0], [1], [0, 0, 1, 1], [], []>} : vector<8x8xf32>, vector<8x8xf32>, vector<8x8xf32> -> vector<8x8xf32>
    %80 = tpu.concatenate %34, %49, %64, %79 in 1 : vector<8x8xf32>, vector<8x8xf32>, vector<8x8xf32>, vector<8x8xf32> -> vector<8x32xf32>
    %cst_33 = arith.constant dense<0.000000e+00> : vector<8x32xf32>
    %81 = tpu.matmul %80, %18, %cst_33 {dimension_numbers = #tpu.dot_dimension_numbers<[1], [0], [0], [1], [0, 0, 1, 1], [], []>} : vector<8x32xf32>, vector<32x32xf32>, vector<8x32xf32> -> vector<8x32xf32>
    %82 = vector.broadcast %19 : vector<1x32xf32> to vector<8x32xf32>
    %83 = arith.addf %81, %82 : vector<8x32xf32>
    %84 = arith.addf %9, %83 : vector<8x32xf32>
    %c1 = arith.constant 1 : index
    %c0_34 = arith.constant 0 : index
    %85 = vector.load %arg17[%c1, %c0_34] : memref<3x32xf32, #tpu.memory_space<vmem>>, vector<1x32xf32>
    %86 = vector.broadcast %85 : vector<1x32xf32> to vector<8x32xf32>
    %87 = arith.mulf %84, %86 : vector<8x32xf32>
    %c1_35 = arith.constant 1 : index
    %c0_36 = arith.constant 0 : index
    %88 = vector.load %arg18[%c1_35, %c0_36] : memref<3x32xf32, #tpu.memory_space<vmem>>, vector<1x32xf32>
    %89 = vector.broadcast %88 : vector<1x32xf32> to vector<8x32xf32>
    %90 = arith.addf %87, %89 : vector<8x32xf32>
    %c0_37 = arith.constant 0 : index
    %c0_38 = arith.constant 0 : index
    %91 = vector.load %arg7[%c0_37, %c0_38] : memref<32x32xf32, #tpu.memory_space<vmem>>, vector<32x32xf32>
    %cst_39 = arith.constant dense<0.000000e+00> : vector<8x32xf32>
    %92 = tpu.matmul %90, %91, %cst_39 {dimension_numbers = #tpu.dot_dimension_numbers<[1], [0], [0], [1], [0, 0, 1, 1], [], []>} : vector<8x32xf32>, vector<32x32xf32>, vector<8x32xf32> -> vector<8x32xf32>
    %c0_40 = arith.constant 0 : index
    %c0_41 = arith.constant 0 : index
    %93 = vector.load %arg8[%c0_40, %c0_41] : memref<1x32xf32, #tpu.memory_space<vmem>>, vector<1x32xf32>
    %94 = vector.broadcast %93 : vector<1x32xf32> to vector<8x32xf32>
    %95 = arith.addf %92, %94 : vector<8x32xf32>
    %c0_42 = arith.constant 0 : index
    %c0_43 = arith.constant 0 : index
    %96 = vector.load %arg9[%c0_42, %c0_43] : memref<32x64xf32, #tpu.memory_space<vmem>>, vector<32x64xf32>
    %cst_44 = arith.constant dense<0.000000e+00> : vector<8x64xf32>
    %97 = tpu.matmul %3, %96, %cst_44 {dimension_numbers = #tpu.dot_dimension_numbers<[1], [0], [0], [1], [0, 0, 1, 1], [], []>} : vector<8x32xf32>, vector<32x64xf32>, vector<8x64xf32> -> vector<8x64xf32>
    %c0_45 = arith.constant 0 : index
    %c0_46 = arith.constant 0 : index
    %98 = vector.load %arg10[%c0_45, %c0_46] : memref<1x64xf32, #tpu.memory_space<vmem>>, vector<1x64xf32>
    %99 = vector.broadcast %98 : vector<1x64xf32> to vector<8x64xf32>
    %100 = arith.addf %97, %99 : vector<8x64xf32>
    %101 = vector.extract_strided_slice %100 {offsets = [0, 0], sizes = [8, 32], strides = [1, 1]} : vector<8x64xf32> to vector<8x32xf32>
    %102 = vector.extract_strided_slice %100 {offsets = [0, 32], sizes = [8, 32], strides = [1, 1]} : vector<8x64xf32> to vector<8x32xf32>
    %c0_47 = arith.constant 0 : index
    %c0_48 = arith.constant 0 : index
    %103 = vector.load %arg11[%c0_47, %c0_48] : memref<32x32xf32, #tpu.memory_space<vmem>>, vector<32x32xf32>
    %c0_49 = arith.constant 0 : index
    %c0_50 = arith.constant 0 : index
    %104 = vector.load %arg12[%c0_49, %c0_50] : memref<1x32xf32, #tpu.memory_space<vmem>>, vector<1x32xf32>
    %105 = vector.extract_strided_slice %95 {offsets = [0, 0], sizes = [8, 8], strides = [1, 1]} : vector<8x32xf32> to vector<8x8xf32>
    %106 = vector.extract_strided_slice %101 {offsets = [0, 0], sizes = [8, 8], strides = [1, 1]} : vector<8x32xf32> to vector<8x8xf32>
    %107 = vector.extract_strided_slice %102 {offsets = [0, 0], sizes = [8, 8], strides = [1, 1]} : vector<8x32xf32> to vector<8x8xf32>
    %cst_51 = arith.constant dense<0.000000e+00> : vector<8x8xf32>
    %108 = tpu.matmul %105, %106, %cst_51 {dimension_numbers = #tpu.dot_dimension_numbers<[1], [1], [0], [0], [0, 0, 1, 0], [], []>} : vector<8x8xf32>, vector<8x8xf32>, vector<8x8xf32> -> vector<8x8xf32>
    %cst_52 = arith.constant dense<0xFF800000> : vector<8xf32>
    %109 = vector.multi_reduction <maximumf>, %108, %cst_52 [1] : vector<8x8xf32> to vector<8xf32>
    %110 = vector.shape_cast %109 : vector<8xf32> to vector<8x1xf32>
    %111 = vector.broadcast %110 : vector<8x1xf32> to vector<8x8xf32>
    %112 = arith.subf %108, %111 : vector<8x8xf32>
    %113 = math.exp %112 : vector<8x8xf32>
    %cst_53 = arith.constant dense<0.000000e+00> : vector<8xf32>
    %114 = vector.multi_reduction <add>, %113, %cst_53 [1] : vector<8x8xf32> to vector<8xf32>
    %115 = vector.shape_cast %114 : vector<8xf32> to vector<8x1xf32>
    %116 = tpu.reciprocal %115 {approx = true} : vector<8x1xf32> -> vector<8x1xf32>
    %117 = vector.broadcast %116 : vector<8x1xf32> to vector<8x8xf32>
    %118 = arith.mulf %113, %117 : vector<8x8xf32>
    %cst_54 = arith.constant dense<0.000000e+00> : vector<8x8xf32>
    %119 = tpu.matmul %118, %107, %cst_54 {dimension_numbers = #tpu.dot_dimension_numbers<[1], [0], [0], [1], [0, 0, 1, 1], [], []>} : vector<8x8xf32>, vector<8x8xf32>, vector<8x8xf32> -> vector<8x8xf32>
    %120 = vector.extract_strided_slice %95 {offsets = [0, 8], sizes = [8, 8], strides = [1, 1]} : vector<8x32xf32> to vector<8x8xf32>
    %121 = vector.extract_strided_slice %101 {offsets = [0, 8], sizes = [8, 8], strides = [1, 1]} : vector<8x32xf32> to vector<8x8xf32>
    %122 = vector.extract_strided_slice %102 {offsets = [0, 8], sizes = [8, 8], strides = [1, 1]} : vector<8x32xf32> to vector<8x8xf32>
    %cst_55 = arith.constant dense<0.000000e+00> : vector<8x8xf32>
    %123 = tpu.matmul %120, %121, %cst_55 {dimension_numbers = #tpu.dot_dimension_numbers<[1], [1], [0], [0], [0, 0, 1, 0], [], []>} : vector<8x8xf32>, vector<8x8xf32>, vector<8x8xf32> -> vector<8x8xf32>
    %cst_56 = arith.constant dense<0xFF800000> : vector<8xf32>
    %124 = vector.multi_reduction <maximumf>, %123, %cst_56 [1] : vector<8x8xf32> to vector<8xf32>
    %125 = vector.shape_cast %124 : vector<8xf32> to vector<8x1xf32>
    %126 = vector.broadcast %125 : vector<8x1xf32> to vector<8x8xf32>
    %127 = arith.subf %123, %126 : vector<8x8xf32>
    %128 = math.exp %127 : vector<8x8xf32>
    %cst_57 = arith.constant dense<0.000000e+00> : vector<8xf32>
    %129 = vector.multi_reduction <add>, %128, %cst_57 [1] : vector<8x8xf32> to vector<8xf32>
    %130 = vector.shape_cast %129 : vector<8xf32> to vector<8x1xf32>
    %131 = tpu.reciprocal %130 {approx = true} : vector<8x1xf32> -> vector<8x1xf32>
    %132 = vector.broadcast %131 : vector<8x1xf32> to vector<8x8xf32>
    %133 = arith.mulf %128, %132 : vector<8x8xf32>
    %cst_58 = arith.constant dense<0.000000e+00> : vector<8x8xf32>
    %134 = tpu.matmul %133, %122, %cst_58 {dimension_numbers = #tpu.dot_dimension_numbers<[1], [0], [0], [1], [0, 0, 1, 1], [], []>} : vector<8x8xf32>, vector<8x8xf32>, vector<8x8xf32> -> vector<8x8xf32>
    %135 = vector.extract_strided_slice %95 {offsets = [0, 16], sizes = [8, 8], strides = [1, 1]} : vector<8x32xf32> to vector<8x8xf32>
    %136 = vector.extract_strided_slice %101 {offsets = [0, 16], sizes = [8, 8], strides = [1, 1]} : vector<8x32xf32> to vector<8x8xf32>
    %137 = vector.extract_strided_slice %102 {offsets = [0, 16], sizes = [8, 8], strides = [1, 1]} : vector<8x32xf32> to vector<8x8xf32>
    %cst_59 = arith.constant dense<0.000000e+00> : vector<8x8xf32>
    %138 = tpu.matmul %135, %136, %cst_59 {dimension_numbers = #tpu.dot_dimension_numbers<[1], [1], [0], [0], [0, 0, 1, 0], [], []>} : vector<8x8xf32>, vector<8x8xf32>, vector<8x8xf32> -> vector<8x8xf32>
    %cst_60 = arith.constant dense<0xFF800000> : vector<8xf32>
    %139 = vector.multi_reduction <maximumf>, %138, %cst_60 [1] : vector<8x8xf32> to vector<8xf32>
    %140 = vector.shape_cast %139 : vector<8xf32> to vector<8x1xf32>
    %141 = vector.broadcast %140 : vector<8x1xf32> to vector<8x8xf32>
    %142 = arith.subf %138, %141 : vector<8x8xf32>
    %143 = math.exp %142 : vector<8x8xf32>
    %cst_61 = arith.constant dense<0.000000e+00> : vector<8xf32>
    %144 = vector.multi_reduction <add>, %143, %cst_61 [1] : vector<8x8xf32> to vector<8xf32>
    %145 = vector.shape_cast %144 : vector<8xf32> to vector<8x1xf32>
    %146 = tpu.reciprocal %145 {approx = true} : vector<8x1xf32> -> vector<8x1xf32>
    %147 = vector.broadcast %146 : vector<8x1xf32> to vector<8x8xf32>
    %148 = arith.mulf %143, %147 : vector<8x8xf32>
    %cst_62 = arith.constant dense<0.000000e+00> : vector<8x8xf32>
    %149 = tpu.matmul %148, %137, %cst_62 {dimension_numbers = #tpu.dot_dimension_numbers<[1], [0], [0], [1], [0, 0, 1, 1], [], []>} : vector<8x8xf32>, vector<8x8xf32>, vector<8x8xf32> -> vector<8x8xf32>
    %150 = vector.extract_strided_slice %95 {offsets = [0, 24], sizes = [8, 8], strides = [1, 1]} : vector<8x32xf32> to vector<8x8xf32>
    %151 = vector.extract_strided_slice %101 {offsets = [0, 24], sizes = [8, 8], strides = [1, 1]} : vector<8x32xf32> to vector<8x8xf32>
    %152 = vector.extract_strided_slice %102 {offsets = [0, 24], sizes = [8, 8], strides = [1, 1]} : vector<8x32xf32> to vector<8x8xf32>
    %cst_63 = arith.constant dense<0.000000e+00> : vector<8x8xf32>
    %153 = tpu.matmul %150, %151, %cst_63 {dimension_numbers = #tpu.dot_dimension_numbers<[1], [1], [0], [0], [0, 0, 1, 0], [], []>} : vector<8x8xf32>, vector<8x8xf32>, vector<8x8xf32> -> vector<8x8xf32>
    %cst_64 = arith.constant dense<0xFF800000> : vector<8xf32>
    %154 = vector.multi_reduction <maximumf>, %153, %cst_64 [1] : vector<8x8xf32> to vector<8xf32>
    %155 = vector.shape_cast %154 : vector<8xf32> to vector<8x1xf32>
    %156 = vector.broadcast %155 : vector<8x1xf32> to vector<8x8xf32>
    %157 = arith.subf %153, %156 : vector<8x8xf32>
    %158 = math.exp %157 : vector<8x8xf32>
    %cst_65 = arith.constant dense<0.000000e+00> : vector<8xf32>
    %159 = vector.multi_reduction <add>, %158, %cst_65 [1] : vector<8x8xf32> to vector<8xf32>
    %160 = vector.shape_cast %159 : vector<8xf32> to vector<8x1xf32>
    %161 = tpu.reciprocal %160 {approx = true} : vector<8x1xf32> -> vector<8x1xf32>
    %162 = vector.broadcast %161 : vector<8x1xf32> to vector<8x8xf32>
    %163 = arith.mulf %158, %162 : vector<8x8xf32>
    %cst_66 = arith.constant dense<0.000000e+00> : vector<8x8xf32>
    %164 = tpu.matmul %163, %152, %cst_66 {dimension_numbers = #tpu.dot_dimension_numbers<[1], [0], [0], [1], [0, 0, 1, 1], [], []>} : vector<8x8xf32>, vector<8x8xf32>, vector<8x8xf32> -> vector<8x8xf32>
    %165 = tpu.concatenate %119, %134, %149, %164 in 1 : vector<8x8xf32>, vector<8x8xf32>, vector<8x8xf32>, vector<8x8xf32> -> vector<8x32xf32>
    %cst_67 = arith.constant dense<0.000000e+00> : vector<8x32xf32>
    %166 = tpu.matmul %165, %103, %cst_67 {dimension_numbers = #tpu.dot_dimension_numbers<[1], [0], [0], [1], [0, 0, 1, 1], [], []>} : vector<8x32xf32>, vector<32x32xf32>, vector<8x32xf32> -> vector<8x32xf32>
    %167 = vector.broadcast %104 : vector<1x32xf32> to vector<8x32xf32>
    %168 = arith.addf %166, %167 : vector<8x32xf32>
    %169 = arith.addf %90, %168 : vector<8x32xf32>
    %c2 = arith.constant 2 : index
    %c0_68 = arith.constant 0 : index
    %170 = vector.load %arg17[%c2, %c0_68] : memref<3x32xf32, #tpu.memory_space<vmem>>, vector<1x32xf32>
    %171 = vector.broadcast %170 : vector<1x32xf32> to vector<8x32xf32>
    %172 = arith.mulf %169, %171 : vector<8x32xf32>
    %c2_69 = arith.constant 2 : index
    %c0_70 = arith.constant 0 : index
    %173 = vector.load %arg18[%c2_69, %c0_70] : memref<3x32xf32, #tpu.memory_space<vmem>>, vector<1x32xf32>
    %174 = vector.broadcast %173 : vector<1x32xf32> to vector<8x32xf32>
    %175 = arith.addf %172, %174 : vector<8x32xf32>
    %c0_71 = arith.constant 0 : index
    %c0_72 = arith.constant 0 : index
    %176 = vector.load %arg13[%c0_71, %c0_72] : memref<32x64xf32, #tpu.memory_space<vmem>>, vector<32x64xf32>
    %cst_73 = arith.constant dense<0.000000e+00> : vector<8x64xf32>
    %177 = tpu.matmul %175, %176, %cst_73 {dimension_numbers = #tpu.dot_dimension_numbers<[1], [0], [0], [1], [0, 0, 1, 1], [], []>} : vector<8x32xf32>, vector<32x64xf32>, vector<8x64xf32> -> vector<8x64xf32>
    %c0_74 = arith.constant 0 : index
    %c0_75 = arith.constant 0 : index
    %178 = vector.load %arg14[%c0_74, %c0_75] : memref<1x64xf32, #tpu.memory_space<vmem>>, vector<1x64xf32>
    %179 = vector.broadcast %178 : vector<1x64xf32> to vector<8x64xf32>
    %180 = arith.addf %177, %179 : vector<8x64xf32>
    %cst_76 = arith.constant 0.000000e+00 : f32
    %181 = vector.broadcast %cst_76 : f32 to vector<8x64xf32>
    %182 = arith.maximumf %180, %181 : vector<8x64xf32>
    %c0_77 = arith.constant 0 : index
    %c0_78 = arith.constant 0 : index
    %183 = vector.load %arg15[%c0_77, %c0_78] : memref<64x32xf32, #tpu.memory_space<vmem>>, vector<64x32xf32>
    %cst_79 = arith.constant dense<0.000000e+00> : vector<8x32xf32>
    %184 = tpu.matmul %182, %183, %cst_79 {dimension_numbers = #tpu.dot_dimension_numbers<[1], [0], [0], [1], [0, 0, 1, 1], [], []>} : vector<8x64xf32>, vector<64x32xf32>, vector<8x32xf32> -> vector<8x32xf32>
    %c0_80 = arith.constant 0 : index
    %c0_81 = arith.constant 0 : index
    %185 = vector.load %arg16[%c0_80, %c0_81] : memref<1x32xf32, #tpu.memory_space<vmem>>, vector<1x32xf32>
    %186 = vector.broadcast %185 : vector<1x32xf32> to vector<8x32xf32>
    %187 = arith.addf %184, %186 : vector<8x32xf32>
    %188 = arith.addf %175, %187 : vector<8x32xf32>
    %c0_82 = arith.constant 0 : index
    %c0_83 = arith.constant 0 : index
    %c0_84 = arith.constant 0 : index
    %189 = vector.load %arg19[%c0_82, %c0_83, %c0_84] : memref<1x8x32xf32, #tpu.memory_space<vmem>>, vector<1x8x32xf32>
    %190 = vector.shape_cast %189 : vector<1x8x32xf32> to vector<8x32xf32>
    %191 = vector.shape_cast %188 : vector<8x32xf32> to vector<1x8x32xf32>
    tpu.vector_store %arg19[%c0_82, %c0_83, %c0_84], %191 {strides = array<i32>} : memref<1x8x32xf32, #tpu.memory_space<vmem>>, vector<1x8x32xf32>,
    return
  }
  func.func @transform_0(%arg0: i32) -> (i32, i32, i32) {
    %c0_i32 = arith.constant 0 : i32
    %c0_i32_0 = arith.constant 0 : i32
    %c0_i32_1 = arith.constant 0 : i32
    return %arg0, %c0_i32, %c0_i32_0 : i32, i32, i32
  }
  func.func @transform_1(%arg0: i32) -> (i32, i32, i32) {
    %c0_i32 = arith.constant 0 : i32
    %c0_i32_0 = arith.constant 0 : i32
    %c0_i32_1 = arith.constant 0 : i32
    return %arg0, %c0_i32, %c0_i32_0 : i32, i32, i32
  }
  func.func @transform_2(%arg0: i32) -> (i32, i32) {
    %c0_i32 = arith.constant 0 : i32
    %c0_i32_0 = arith.constant 0 : i32
    %c0_i32_1 = arith.constant 0 : i32
    return %c0_i32, %c0_i32_0 : i32, i32
  }
  func.func @transform_3(%arg0: i32) -> (i32, i32) {
    %c0_i32 = arith.constant 0 : i32
    %c0_i32_0 = arith.constant 0 : i32
    %c0_i32_1 = arith.constant 0 : i32
    return %c0_i32, %c0_i32_0 : i32, i32
  }
  func.func @transform_4(%arg0: i32) -> (i32, i32) {
    %c0_i32 = arith.constant 0 : i32
    %c0_i32_0 = arith.constant 0 : i32
    %c0_i32_1 = arith.constant 0 : i32
    return %c0_i32, %c0_i32_0 : i32, i32
  }
  func.func @transform_5(%arg0: i32) -> (i32, i32) {
    %c0_i32 = arith.constant 0 : i32
    %c0_i32_0 = arith.constant 0 : i32
    %c0_i32_1 = arith.constant 0 : i32
    return %c0_i32, %c0_i32_0 : i32, i32
  }
  func.func @transform_6(%arg0: i32) -> (i32, i32) {
    %c0_i32 = arith.constant 0 : i32
    %c0_i32_0 = arith.constant 0 : i32
    %c0_i32_1 = arith.constant 0 : i32
    return %c0_i32, %c0_i32_0 : i32, i32
  }
  func.func @transform_7(%arg0: i32) -> (i32, i32) {
    %c0_i32 = arith.constant 0 : i32
    %c0_i32_0 = arith.constant 0 : i32
    %c0_i32_1 = arith.constant 0 : i32
    return %c0_i32, %c0_i32_0 : i32, i32
  }
  func.func @transform_8(%arg0: i32) -> (i32, i32) {
    %c0_i32 = arith.constant 0 : i32
    %c0_i32_0 = arith.constant 0 : i32
    %c0_i32_1 = arith.constant 0 : i32
    return %c0_i32, %c0_i32_0 : i32, i32
  }
  func.func @transform_9(%arg0: i32) -> (i32, i32) {
    %c0_i32 = arith.constant 0 : i32
    %c0_i32_0 = arith.constant 0 : i32
    %c0_i32_1 = arith.constant 0 : i32
    return %c0_i32, %c0_i32_0 : i32, i32
  }
  func.func @transform_10(%arg0: i32) -> (i32, i32) {
    %c0_i32 = arith.constant 0 : i32
    %c0_i32_0 = arith.constant 0 : i32
    %c0_i32_1 = arith.constant 0 : i32
    return %c0_i32, %c0_i32_0 : i32, i32
  }
  func.func @transform_11(%arg0: i32) -> (i32, i32) {
    %c0_i32 = arith.constant 0 : i32
    %c0_i32_0 = arith.constant 0 : i32
    %c0_i32_1 = arith.constant 0 : i32
    return %c0_i32, %c0_i32_0 : i32, i32
  }
  func.func @transform_12(%arg0: i32) -> (i32, i32) {
    %c0_i32 = arith.constant 0 : i32
    %c0_i32_0 = arith.constant 0 : i32
    %c0_i32_1 = arith.constant 0 : i32
    return %c0_i32, %c0_i32_0 : i32, i32
  }
  func.func @transform_13(%arg0: i32) -> (i32, i32) {
    %c0_i32 = arith.constant 0 : i32
    %c0_i32_0 = arith.constant 0 : i32
    %c0_i32_1 = arith.constant 0 : i32
    return %c0_i32, %c0_i32_0 : i32, i32
  }
  func.func @transform_14(%arg0: i32) -> (i32, i32) {
    %c0_i32 = arith.constant 0 : i32
    %c0_i32_0 = arith.constant 0 : i32
    %c0_i32_1 = arith.constant 0 : i32
    return %c0_i32, %c0_i32_0 : i32, i32
  }
  func.func @transform_15(%arg0: i32) -> (i32, i32) {
    %c0_i32 = arith.constant 0 : i32
    %c0_i32_0 = arith.constant 0 : i32
    %c0_i32_1 = arith.constant 0 : i32
    return %c0_i32, %c0_i32_0 : i32, i32
  }
  func.func @transform_16(%arg0: i32) -> (i32, i32) {
    %c0_i32 = arith.constant 0 : i32
    %c0_i32_0 = arith.constant 0 : i32
    %c0_i32_1 = arith.constant 0 : i32
    return %c0_i32, %c0_i32_0 : i32, i32
  }
  func.func @transform_17(%arg0: i32) -> (i32, i32) {
    %c0_i32 = arith.constant 0 : i32
    %c0_i32_0 = arith.constant 0 : i32
    %c0_i32_1 = arith.constant 0 : i32
    return %c0_i32, %c0_i32_0 : i32, i32
  }
  func.func @transform_18(%arg0: i32) -> (i32, i32, i32) {
    %c0_i32 = arith.constant 0 : i32
    %c0_i32_0 = arith.constant 0 : i32
    %c0_i32_1 = arith.constant 0 : i32
    return %arg0, %c0_i32, %c0_i32_0 : i32, i32, i32
  }
}

</mosaic_0001>

<bundles_post_ra>
// kernel: tpu_custom_call.1
= control target key start
LH: loop header
LB: loop body
LE: loop exit
PB: predicated region body
PF: predicated region fallthrough
CT: control target
= control target key end

     0   :  { %s4182_s0 = inlined_call_operand.hbm [shape: f32[2,8,32], index: 0, kind: input, shape index: {}]   ;;  %s4183_s1 = inlined_call_operand.hbm [shape: f32[2,8,32], index: 1, kind: input, shape index: {}]   ;;  %s4184_s2 = inlined_call_operand.vmem [shape: f32[32,96], index: 2, kind: input, shape index: {}]   ;;  %s4185_s3 = inlined_call_operand.vmem [shape: f32[1,96], index: 3, kind: input, shape index: {}]   ;;  %s4186_s4 = inlined_call_operand.vmem [shape: f32[32,32], index: 4, kind: input, shape index: {}]   ;;  %s4187_s5 = inlined_call_operand.hbm [shape: f32[1,32], index: 5, kind: input, shape index: {}]   ;;  %s4188_s6 = inlined_call_operand.vmem [shape: f32[32,32], index: 6, kind: input, shape index: {}]   ;;  %s4189_s7 = inlined_call_operand.vmem [shape: f32[1,32], index: 7, kind: input, shape index: {}]   ;;  %s4190_s8 = inlined_call_operand.hbm [shape: f32[32,64], index: 8, kind: input, shape index: {}]   ;;  %s4191_s9 = inlined_call_operand.vmem [shape: f32[1,64], index: 9, kind: input, shape index: {}]   ;;  %s4192_s10 = inlined_call_operand.hbm [shape: f32[32,32], index: 10, kind: input, shape index: {}]   ;;  %s4193_s11 = inlined_call_operand.vmem [shape: f32[1,32], index: 11, kind: input, shape index: {}]   ;;  %s4194_s12 = inlined_call_operand.hbm [shape: f32[32,64], index: 12, kind: input, shape index: {}]   ;;  %s4195_s13 = inlined_call_operand.vmem [shape: f32[1,64], index: 13, kind: input, shape index: {}]   ;;  %s4196_s14 = inlined_call_operand.vmem [shape: f32[64,32], index: 14, kind: input, shape index: {}]   ;;  %s4197_s15 = inlined_call_operand.vmem [shape: f32[1,32], index: 15, kind: input, shape index: {}]   ;;  %s4198_s16 = inlined_call_operand.vmem [shape: f32[3,32], index: 16, kind: input, shape index: {}]   ;;  %s4199_s17 = inlined_call_operand.vmem [shape: f32[3,32], index: 17, kind: input, shape index: {}]   ;;  %s4200_s18 = inlined_call_operand.hbm [shape: f32[2,8,32], index: 18, kind: output, shape index: {}]  }
   0x1   :  { %4219 = sst [smem:[#allocation26_spill]] %s4182_s0 }
   0x2   :  { %4220 = sst [smem:[#allocation27_spill]] %s4183_s1 }
   0x3   :  { %4221 = sst [smem:[#allocation28_spill]] %s4184_s2 }
   0x4   :  { %4222 = sst [smem:[#allocation29_spill]] %s4187_s5 }
   0x5   :  { %4223 = sst [smem:[#allocation30_spill]] %s4190_s8 }
   0x6   :  { %4224 = sst [smem:[#allocation31_spill]] %s4192_s10 }
   0x7   :  { %4225 = sst [smem:[#allocation32_spill]] %s4193_s11 }
   0x8   :  { %4226 = sst [smem:[#allocation33_spill]] %s4194_s12 }
   0x9   :  { %4227 = sst [smem:[#allocation34_spill]] %s4195_s13 }
   0xa   :  { %4228 = sst [smem:[#allocation35_spill]] %s4197_s15 }
   0xb   :  { %4229 = sst [smem:[#allocation36_spill]] %s4200_s18 }
   0xc   :  { %23 = vsyncpa [#allocation3], 0 }
   0xd   :  { %25 = vsyncpa [#allocation3 + $0x1], 0 }
   0xe   :  { %26 = vsyncpa [#allocation6], 0 }
   0xf   :  { %28 = vsyncpa [#allocation6 + $0x1], 0 }
  0x10   :  { %29 = vsyncpa [#allocation9], 0 }
  0x11   :  { %30 = vsyncpa [#allocation12], 0 }
  0x12   :  { %31 = vsyncpa [#allocation4], 0 }
  0x13   :  { %33 = vsyncpa [#allocation4 + $0x1], 0  ;;  %s3623_s27 = smov 0   ;;  %s3625_s28 = smov 0  }
  0x14   :  { %s3627_s29 = smov 0   ;;  %s3629_s30 = smov 0  }
  0x15 LB: > { %4230 = sst [smem:[#allocation20_spill]] %s3489_s27  ;;  %s3503_s0 = smov [#allocation7]   ;;  %s3501_s30 = sphi %s3629_s30, %s4271_s30   ;;  %s3497_s29 = sphi %s3627_s29, %s4276_s29   ;;  %s3493_s28 = sphi %s3625_s28, %s4275_s28   ;;  %s3489_s27 = sphi %s3623_s27, %s4274_s27  }
  0x16   : > { %4231 = sst [smem:[#allocation21_spill]] %s3497_s29  ;;  %s480_s19 = sshll.u32 %s3503_s0, 4  ;;  %s481_s19 = int_to_ptr.vmem [resolvable:$true] %s480_s19 }
  0x17   : > { %s3644_s1 = sadd.s32 4294967295, %s3501_s30   ;;  %p2817_p0 = scmp.ge.s32.totalorder %s3501_s30, 1 }
  0x18   : > { %p4212_p1 = scmp.eq.s32.totalorder %s3644_s1, 0  ;;  %p458_p2 = scmp.lt.s32.totalorder %s3501_s30, 3 }
  0x19   : > { %s3504_s21 = smov [#allocation8]   ;;  %s3505_s23 = smov [#allocation10]  }
  0x1a   : > { %p3649_p3 = pnand %p2817_p0, %p458_p2  ;;  %s496_s22 = sshll.u32 %s3504_s21, 4  ;;  %s3656_s22 = int_to_ptr.vmem [resolvable:$true] %s496_s22 }
  0x1b   : > { %s512_s24 = sshll.u32 %s3505_s23, 4  ;;  %s3272_s25 = scalar_lea.vmem %s481_s19, 16  ;;  %s3664_s24 = int_to_ptr.vmem [resolvable:$true] %s512_s24 }
  0x1c   : > { %s4232_s20 = scalar_select %p3649_p3, 1, 0 }
  0x1d   : > { %p3141_p5 = pneg %p3649_p3  ;;  %p3273_p8 = scmp.ne.s32.totalorder %s481_s19, %s3272_s25 }
  0x1e   : > { %s3279_s26 = scalar_lea.vmem %s481_s19, 32  ;;  %p3280_p11 = scmp.lt.s32.totalorder %s481_s19, %s481_s19 }
  0x1f   : > { %p3660_p6 = pnand %p3141_p5, %p4212_p1  ;;  %p3281_p12 = scmp.lt.s32.totalorder %s3279_s26, %s3272_s25 }
  0x21   : > { %p3263_p7 = pneg %p3660_p6  ;;  %p3282_p13 = por %p3281_p12, %p3280_p11 }
  0x23   : > { %p3275_p9 = pnand %p3273_p8, %p3263_p7 }
  0x25   : > { %p3276_p10 = pneg %p3275_p9 }
  0x27   : > { %p3283_p0 = pnand %p3282_p13, %p3276_p10 }
  0x29   : > { %3286 = shalt.err (!%p3283_p0)
}
  0x2a   : > { %s4234_s5 = sld [smem:[#allocation29_spill]]  ;;  %s3298_s23 = scalar_lea.vmem %s3656_s22, 512 }
  0x2b   : > { %p3299_p2 = scmp.ne.s32.totalorder %s3656_s22, %s3298_s23  ;;  %p3306_p9 = scmp.lt.s32.totalorder %s3656_s22, %s3656_s22 }
  0x2c   : > { %p3307_p10 = scmp.lt.s32.totalorder %s3298_s23, %s3298_s23 }
  0x2d   : > { %p3301_p5 = pnand %p3299_p2, %p3263_p7 }
  0x2e   : > { %p3308_p11 = por %p3307_p10, %p3306_p9 }
  0x2f   : > { %p3302_p8 = pneg %p3301_p5 }
  0x30   : > { %3144 = dma.hbm_to_vmem [thread:$0]  (!%p3660_p6), %s4234_s5, 16, %s481_s19, [#allocation6]  }
  0x31   : > { %p3309_p12 = pnand %p3308_p11, %p3302_p8 }
  0x33   : > { %3312 = shalt.err (!%p3309_p12)
}
  0x34   : > { %s3506_s25 = smov 128   ;;  %s3507_s19 = smov 8  }
  0x35   : > { %s4235_s8 = sld [smem:[#allocation30_spill]]  ;;  %s3324_s21 = scalar_lea.vmem %s3664_s24, 512 }
  0x36   : > { %p3325_p13 = scmp.ne.s32.totalorder %s3664_s24, %s3324_s21  ;;  %p3332_p5 = scmp.lt.s32.totalorder %s3664_s24, %s3664_s24 }
  0x37   : > { %p3333_p8 = scmp.lt.s32.totalorder %s3324_s21, %s3324_s21 }
  0x38   : > { %p3327_p0 = pnand %p3325_p13, %p3263_p7 }
  0x39   : > { %p3334_p9 = por %p3333_p8, %p3332_p5 }
  0x3a   : > { %p3328_p2 = pneg %p3327_p0 }
  0x3b   : > { %3147 = dma.hbm_to_vmem [thread:$0]  (!%p3660_p6), %s4235_s8, 512, %s3656_s22, [#allocation9], %s3506_s25, %s3506_s25, %s3507_s19  }
  0x3c   : > { %p3335_p10 = pnand %p3334_p9, %p3328_p2 }
  0x3e   : > { %3338 = shalt.err (!%p3335_p10)
}
  0x3f   : > { %s4236_s10 = sld [smem:[#allocation31_spill]]  ;;  %s3508_s22 = smov [#allocation11]  }
  0x40   : > { %s528_s26 = sshll.u32 %s3508_s22, 4  ;;  %s529_s26 = int_to_ptr.vmem [resolvable:$true] %s528_s26 }
  0x41   : > { %s3350_s0 = scalar_lea.vmem %s529_s26, 512  ;;  %p3358_p0 = scmp.lt.s32.totalorder %s529_s26, %s529_s26 }
  0x42   : > { %p3351_p11 = scmp.ne.s32.totalorder %s529_s26, %s3350_s0  ;;  %p3359_p2 = scmp.lt.s32.totalorder %s3350_s0, %s3350_s0 }
  0x44   : > { %p3353_p12 = pnand %p3351_p11, %p3263_p7  ;;  %p3360_p5 = por %p3359_p2, %p3358_p0 }
  0x45   : > { %3150 = dma.hbm_to_vmem [thread:$0]  (!%p3660_p6), %s4236_s10, 512, %s3664_s24, [#allocation9], %s3506_s25, %s3506_s25, %s3507_s19  }
  0x46   : > { %p3354_p13 = pneg %p3353_p12 }
  0x48   : > { %p3361_p8 = pnand %p3360_p5, %p3354_p13 }
  0x4a   : > { %3364 = shalt.err (!%p3361_p8)
}
  0x4b   : > { %s4237_s12 = sld [smem:[#allocation33_spill]]  ;;  %s2816_s24 = sadd.s32 4294967294, %s3501_s30  }
  0x4c   : > { %s3712_s2 = sadd.s32 1, %s3501_s30   ;;  %s46_s22 = sadd.s32 1, %s3497_s29 }
  0x4d   : > { %4238 = sst [smem:[#allocation22_spill]] %s3712_s2  ;;  %s43_s23 = ssub.s32 %s3501_s30, %s3712_s2 }
  0x4e   : > { %p44_p7 = scmp.eq.s32.totalorder %s43_s23, 0  ;;  %p53_p9 = scmp.ne.s32.totalorder %s3497_s29, %s3493_s28 }
  0x4f   : > { %p54_p10 = scmp.eq.s32.totalorder %s3501_s30, 0  ;;  %p59_p11 = scmp.ne.s32.totalorder %s3493_s28, %s3489_s27 }
  0x50   : > { %s3723_s0 = scalar_select %p44_p7, %s3497_s29, %s46_s22  }
  0x51   : > { %3153 = dma.hbm_to_vmem [thread:$0]  (!%p3660_p6), %s4237_s12, 512, %s529_s26, [#allocation12], %s3506_s25, %s3506_s25, %s3507_s19  }
  0x52   : > { %4239 = sst [smem:[#allocation23_spill]] %s3723_s0  ;;  %p3725_p12 = por %p54_p10, %p53_p9 }
  0x53   : > { %p3731_p6 = por %p4212_p1, %p59_p11  ;;  %p445_p13 = scmp.eq.s32.totalorder %s3644_s1, 1 }
  0x54   : > { %p451_p0 = scmp.eq.s32.totalorder %s2816_s24, 1  ;;  %p3169_p2 = scmp.lt.s32.totalorder %s3501_s30, 2 }
  0x55   : > { %s4241_s25 = scalar_select %p3731_p6, 1, 0 }
  0x56   : > { %s557_s19 = sand.u32 1, %s3497_s29   ;;  %p3738_p5 = por %p445_p13, %p53_p9 }
  0x57   : > { %p3742_p8 = por %p451_p0, %p59_p11  ;;  %s3746_s23 = sshll.u32 %s557_s19, 3 }
  0x58   : > { %s4242_s26 = scalar_select %p3738_p5, 1, 0 }
  0x59   : > { %s4244_s5 = scalar_select %p3742_p8, 1, 0 }
  0x5a   : > { %4243 = sst [smem:[#allocation24_spill]] %s4242_s26  ;;  %s2824_s22 = sshll.u32 %s3501_s30, 7 }
  0x5b   : > { %4245 = sst [smem:[#allocation25_spill]] %s4244_s5  ;;  %s561_s24 = scalar_lea.vmem [#allocation2], %s3746_s23 }
  0x5c   : > { %s4246_s12 = sld [smem:[#allocation26_spill]]  ;;  %s568_s29 = sshll.u32 %s561_s24, 4  ;;  %s3755_s29 = int_to_ptr.vmem [resolvable:$true] %s568_s29 }
  0x5d   : > { %p3759_p7 = pnand %p3169_p2, %p3725_p12  ;;  %s4248_s18 = sld [smem:[#allocation27_spill]] }
  0x5e   : > { %s575_s10 = sand.u32 1, %s3501_s30   ;;  %s558_s15 = scalar_lea.sflag [#allocation3], %s557_s19 }
  0x5f   : > { %p3367_p10 = pneg %p3759_p7 }
  0x62   : > { %s3752_s0 = scalar_lea.hbm %s4246_s12, %s2824_s22  ;;  %s3370_s13 = scalar_lea.hbm %s4246_s12, 256 }
  0x63   : > { %s3766_s8 = scalar_lea.hbm %s4248_s18, %s2824_s22  ;;  %s3365_s26 = scalar_lea.hbm %s3752_s0, 128 }
  0x64   : > { %p3366_p9 = scmp.ne.s32.totalorder %s3752_s0, %s3365_s26  ;;  %p3371_p13 = scmp.lt.s32.totalorder %s3752_s0, %s4246_s12 }
  0x65   : > { %p3372_p0 = scmp.lt.s32.totalorder %s3370_s13, %s3365_s26 }
  0x66   : > { %p3368_p11 = pnand %p3367_p10, %p3366_p9 }
  0x67   : > { %p3373_p2 = por %p3372_p0, %p3371_p13 }
  0x68   : > { %p3369_p12 = pneg %p3368_p11 }
  0x6a   : > { %p3374_p4 = pnand %p3373_p2, %p3369_p12 }
  0x6c   : > { %3377 = shalt.err (!%p3374_p4)
}
  0x6d   : > { %s3378_s19 = scalar_lea.vmem %s3755_s29, 128  ;;  %s3509_s5 = smov [#allocation2]  }
  0x6e   : > { %p3379_p1 = scmp.ne.s32.totalorder %s3755_s29, %s3378_s19  ;;  %s3383_s22 = sshll.u32 %s3509_s5, 4  ;;  %s3384_s22 = int_to_ptr.vmem [resolvable:$false] %s3383_s22 }
  0x6f   : > { %s3385_s21 = scalar_lea.vmem %s3384_s22, 256  ;;  %p3386_p8 = scmp.lt.s32.totalorder %s3755_s29, %s3384_s22 }
  0x70   : > { %p3381_p9 = pnand %p3379_p1, %p3367_p10  ;;  %p3387_p5 = scmp.lt.s32.totalorder %s3385_s21, %s3378_s19 }
  0x72   : > { %p3382_p11 = pneg %p3381_p9  ;;  %p3388_p6 = por %p3387_p5, %p3386_p8 }
  0x74   : > { %p3389_p13 = pnand %p3388_p6, %p3382_p11 }
  0x76   : > { %3392 = shalt.err (!%p3389_p13)
}
  0x77   : > { %3157 = dma.hbm_to_vmem [thread:$0]  (!%p3759_p7), %s3752_s0, 128, %s3755_s29, %s558_s15  }
  0x78   : > { %s579_s11 = scalar_lea.vmem [#allocation5], %s3746_s23  ;;  %s576_s26 = scalar_lea.sflag [#allocation6], %s575_s10 }
  0x79   : > { %s586_s13 = sshll.u32 %s579_s11, 4  ;;  %s3393_s24 = scalar_lea.hbm %s3766_s8, 128  ;;  %s587_s13 = int_to_ptr.vmem [resolvable:$true] %s586_s13 }
  0x7a   : > { %p3394_p1 = scmp.ne.s32.totalorder %s3766_s8, %s3393_s24  ;;  %s3398_s5 = scalar_lea.hbm %s4248_s18, 256 }
  0x7b   : > { %p3399_p5 = scmp.lt.s32.totalorder %s3766_s8, %s4248_s18  ;;  %p3400_p8 = scmp.lt.s32.totalorder %s3398_s5, %s3393_s24 }
  0x7c   : > { %p3396_p4 = pnand %p3394_p1, %p3367_p10 }
  0x7d   : > { %p3401_p12 = por %p3400_p8, %p3399_p5 }
  0x7e   : > { %p3397_p6 = pneg %p3396_p4 }
  0x80   : > { %p3402_p0 = pnand %p3401_p12, %p3397_p6 }
  0x82   : > { %3405 = shalt.err (!%p3402_p0)
}
  0x83   : > { %s3406_s15 = scalar_lea.vmem %s587_s13, 128  ;;  %s3510_s29 = smov [#allocation5]  }
  0x84   : > { %p3407_p2 = scmp.ne.s32.totalorder %s587_s13, %s3406_s15  ;;  %s3411_s0 = sshll.u32 %s3510_s29, 4  ;;  %s3412_s0 = int_to_ptr.vmem [resolvable:$false] %s3411_s0 }
  0x85   : > { %s3413_s23 = scalar_lea.vmem %s3412_s0, 256  ;;  %p3414_p13 = scmp.lt.s32.totalorder %s587_s13, %s3412_s0 }
  0x86   : > { %p3409_p9 = pnand %p3407_p2, %p3367_p10  ;;  %p3415_p1 = scmp.lt.s32.totalorder %s3413_s23, %s3406_s15 }
  0x88   : > { %p3410_p11 = pneg %p3409_p9  ;;  %p3416_p4 = por %p3415_p1, %p3414_p13 }
  0x8a   : > { %p3417_p3 = pnand %p3416_p4, %p3410_p11 }
  0x8c   : > { %3420 = shalt.err (!%p3417_p3)
}
  0x8d   : > { %3160 = dma.hbm_to_vmem [thread:$0]  (!%p3759_p7), %s3766_s8, 128, %s587_s13, %s576_s26  }
  0x8e   : > { %p4249_p6 = scmp.ne.s32.totalorder %s4232_s20, 0 }
  0x8f   : > { %s3817_s10 = sand.u32 (!%p4249_p6), 1, %s3493_s28   ;;  %p4250_p10 = scmp.ne.s32.totalorder (!%p4249_p6), %s4241_s25, 0 }
  0x90   : > { %595 = sbr.rel (%p4249_p6) target bundleno = 3301 (0xce5), region = 92  ;;  %s3820_s11 = sshll.u32 (!%p4249_p6), %s3817_s10, 3 }
  0x91   : > { %s598_s24 = scalar_lea.sflag (!%p4249_p6), [#allocation3], %s3817_s10  ;;  %s601_s27 = scalar_lea.vmem (!%p4249_p6), [#allocation2], %s3820_s11 }
  0x95   : > { %3464 = dma.done.wait (%p4250_p10), %s598_s24, 128  }
  0x96   : > { %3466 = vsyncadd (%p4250_p10), %s598_s24, 4294967168  ;;  %s606_s20 = sand.u32 1, %s3644_s1   ;;  %s610_s8 = scalar_lea.vmem [#allocation5], %s3820_s11 }
  0x97   : > { %s607_s2 = scalar_lea.sflag [#allocation6], %s606_s20 }
  0x98   : > { %3468 = dma.done.wait (%p4250_p10), %s607_s2, 128  }
  0x99   : > { %3470 = vsyncadd (%p4250_p10), %s607_s2, 4294967168  ;;  %p4251_p3 = scmp.eq.s32.totalorder %s3644_s1, 0 }
  0x9b   : > { %3472 = dma.done.wait (%p4251_p3), [#allocation6], 16   ;;  %p4252_p7 = pmov %p4251_p3 }
  0x9c   : > { %p4253_p5 = pmov %p4251_p3 }
  0x9d   : > { %3474 = vsyncadd (%p4252_p7), [#allocation6], 4294967280 }
  0x9e   : > { %3476 = dma.done.wait (%p4253_p5), [#allocation9], 1024   ;;  %p4254_p8 = pmov %p4251_p3 }
  0x9f   : > { %p4255_p12 = pmov %p4251_p3 }
  0xa0   : > { %3478 = vsyncadd (%p4254_p8), [#allocation9], 4294966272 }
  0xa1   : > { %3480 = dma.done.wait (%p4255_p12), [#allocation12], 512   ;;  %p4256_p0 = pmov %p4251_p3 }
  0xa2   : > { %v3511_v0 = vmov 0.0   ;;  %vm3512_vm0 = vmmov 0   ;;  %s4257_s26 = sld [smem:[#allocation28_spill]]  ;;  %v684_v3 = vld [vmem:[%s601_s27] sm:$0xff]  ;;  %vm709_vm1 = vcmask 261120   ;;  %s3513_s25 = smov 120  }
  0xa3   : > { %3482 = vsyncadd (%p4256_p0), [#allocation12], 4294966784  ;;  %2954 = vmatprep.subr.mxu1 %v3511_v0  ;;  %2962 = vmatprep.mubr.msk.f32.mxu1 %vm3512_vm0, %v3511_v0  ;;  %v2835_v4 = vld [vmem:[%s4198_s16] ss:$0 sm:$0xff]  ;;  %s3514_s13 = smov 96   ;;  %s3515_s19 = smov 80  }
  0xa4   : > { %2975 = vmatprep.subr.mxu0 %v3511_v0  ;;  %2977 = vmatprep.mubr.msk.f32.mxu0 %vm3512_vm0, %v3511_v0  ;;  %v691_v6 = vmul.f32 %v2835_v4, %v684_v3  ;;  %v2836_v7 = vld [vmem:[%s4199_s17] ss:$0 sm:$0xff]  ;;  %s3516_s5 = smov 88   ;;  %s3517_s22 = smov 72   ;;  %vm791_vm2 = vcmask 64512   ;;  %vm1461_vm3 = vcmask 130048  }
  0xa5   : > { %v2837_v10 = vld [vmem:[%s4185_s3] ss:$0 sm:$0xff]  ;;  %s3518_s21 = smov 112   ;;  %s3519_s15 = smov 104   ;;  %vm1463_vm4 = vcmask 195584   ;;  %vm2595_vm5 = vcmask 523264  }
  0xa6   : > { %v3872_v9 = vadd.f32 %v2836_v7, %v691_v6  ;;  %s3520_s29 = smov 56   ;;  %s3521_s0 = smov 64   ;;  %v786_v6 = vld [vmem:[%s4186_s4 + $0x18] sm:$0xff] }
  0xa7   : > { %s3522_s23 = smov 48   ;;  %s3523_s24 = smov 40  }
  0xa8   : > { %v701_v1 = vld [vmem:[%s4257_s26 + $0x18] sm:$0xff]  ;;  %v700_v2 = vld [vmem:[%s4257_s26 + $0x10] sm:$0xff]  ;;  %v699_v5 = vld [vmem:[%s4257_s26 + $0x8] sm:$0xff]  ;;  %s4218_s2 = smov 8   ;;  %s4262_s20 = sld [smem:[#allocation34_spill]] }
  0xa9   : > { %2955 = vmatpush3.msra.mxu1 %v701_v1  ;;  %v698_v8 = vld [vmem:[%s4257_s26] sm:$0xff]  ;;  %s2672_s27 = scalar_lea.sflag [#allocation4], %s3817_s10 }
  0xaa   : > { %2956 = vmatprep.subr.mxu1 %v3511_v0 }
  0xab   : > { %2957 = vmatpush3.msra.mxu1 %v700_v2 }
  0xac   : > { %2958 = vmatprep.subr.mxu1 %v3511_v0 }
  0xad   : > { %2959 = vmatpush3.msra.mxu1 %v699_v5 }
  0xae   : > { %2960 = vmatprep.subr.mxu1 %v3511_v0 }
  0xaf   : > { %2961 = vmatpush3.msra.mxu1 %v698_v8 }
  0xb0   : > { %2963 = vmatmul.mubr.msk.f32.vlgmr.msra.gmra.mxu1 %vm709_vm1, %v3872_v9  ;;  %2965 = vmatprep.subr.mxu1 %v3511_v0 }
  0xb1   : > { %2967 = vmatprep.mubr.msk.f32.mxu1 %vm3512_vm0, %v3511_v0 }
 0x170   : > { %v779_v11 = vpop.f32.mrf.mxu1 }
 0x171   : > { %v3883_v12 = vadd.f32 %v2837_v10, %v779_v11 }
 0x172   : > { %v2964_v13 = vpop.f32.mrf.mxu1 }
 0x173   : > { %953 = vrot.lane.b32.xlu1 %v3883_v12, %s3513_s25  ;;  %789 = vrot.lane.b32.xlu0 %v3883_v12, %s3514_s13  ;;  %v784_v13 = vld [vmem:[%s4186_s4 + $0x8] sm:$0xff] }
 0x177   : > { %1120 = vrot.lane.b32.xlu1 %v3883_v12, %s3515_s19  ;;  %955 = vrot.lane.b32.xlu0 %v3883_v12, %s3516_s5 }
 0x17b   : > { %1285 = vrot.lane.b32.xlu1 %v3883_v12, %s3517_s22  ;;  %1118 = vrot.lane.b32.xlu0 %v3883_v12, %s3518_s21 }
 0x17f   : > { %1283 = vrot.lane.b32.xlu0 %v3883_v12, %s3519_s15 }
 0x1e5   : > { %v954_v14 = vpop.permute.xlu1 %953  ;;  %v790_v15 = vpop.permute.xlu0 %789 }
 0x1e6   : > { %2966 = vmatpush3.xpose.msk.msra.mxu1 %vm791_vm2, %v790_v15 }
 0x1e7   : > { %2970 = vmatprep.subr.mxu1 %v3511_v0 }
 0x1e9   : > { %2968 = vmatmul.mubr.msk.f32.vlgmr.msra.gmra.mxu1 %vm791_vm2, %v3883_v12  ;;  %v956_v16 = vpop.permute.xlu0 %955  ;;  %v1121_v17 = vpop.permute.xlu1 %1120 }
 0x1ea   : > { %2976 = vmatpush3.xpose.msk.msra.mxu0 %vm791_vm2, %v956_v16  ;;  %2972 = vmatprep.mubr.msk.f32.mxu1 %vm3512_vm0, %v3511_v0 }
 0x1eb   : > { %2985 = vmatprep.subr.mxu0 %v3511_v0 }
 0x1ed   : > { %2978 = vmatmul.mubr.msk.f32.vlgmr.msra.gmra.mxu0 %vm791_vm2, %v954_v14  ;;  %v1119_v18 = vpop.permute.xlu0 %1118  ;;  %v1286_v19 = vpop.permute.xlu1 %1285  ;;  %v783_v14 = vld [vmem:[%s4186_s4] sm:$0xff] }
 0x1ee   : > { %2986 = vmatpush3.xpose.msk.msra.mxu0 %vm791_vm2, %v1121_v17  ;;  %2987 = vmatprep.mubr.msk.f32.mxu0 %vm3512_vm0, %v3511_v0 }
 0x1ef   : > { %2995 = vmatprep.subr.mxu0 %v3511_v0 }
 0x1f1   : > { %2988 = vmatmul.mubr.msk.f32.vlgmr.msra.gmra.mxu0 %vm791_vm2, %v1119_v18  ;;  %v1284_v20 = vpop.permute.xlu0 %1283 }
 0x1f2   : > { %2996 = vmatpush3.xpose.msk.msra.mxu0 %vm791_vm2, %v1286_v19  ;;  %2997 = vmatprep.mubr.msk.f32.mxu0 %vm3512_vm0, %v3511_v0 }
 0x1f3   : > { %3005 = vmatprep.subr.mxu0 %v3511_v0 }
 0x1f5   : > { %2998 = vmatmul.mubr.msk.f32.vlgmr.msra.gmra.mxu0 %vm791_vm2, %v1284_v20 }
 0x1f6   : > { %3013 = vmatprep.mubr.msk.f32.mxu0 %vm3512_vm0, %v3511_v0  ;;  %3006 = vmatpush3.msra.mxu0 %v786_v6 }
 0x1f7   : > { %3007 = vmatprep.subr.mxu0 %v3511_v0 }
 0x2a9   : > { %v862_v21 = vpop.f32.mrf.mxu1 }
 0x2aa   : > { %v866_v22 = vsel %vm791_vm2, %v862_v21, -inf }
 0x2ab   : > { %867 = vmax.xlane.f32.xlu1 %v866_v22  ;;  %v2969_v23 = vpop.f32.mrf.mxu1 }
 0x2ad   : > { %v1027_v24 = vpop.f32.mrf.mxu0 }
 0x2ae   : > { %v1031_v25 = vsel %vm791_vm2, %v1027_v24, -inf }
 0x2af   : > { %1032 = vmax.xlane.f32.xlu0 %v1031_v25  ;;  %v2979_v26 = vpop.f32.mrf.mxu0 }
 0x2b0   : > { %v1643_v26 = vld [vmem:[#allocation8 + $0x10] sm:$0xff] }
 0x2b1   : > { %v1192_v27 = vpop.f32.mrf.mxu0 }
 0x2b2   : > { %v1196_v28 = vsel %vm791_vm2, %v1192_v27, -inf }
 0x2b3   : > { %1197 = vmax.xlane.f32.xlu0 %v1196_v28  ;;  %v2989_v29 = vpop.f32.mrf.mxu0  ;;  %v1641_v28 = vld [vmem:[#allocation8] sm:$0xff] }
 0x2b4   : > { %v685_v29 = vld [vmem:[%s610_s8] sm:$0xff]  ;;  %s4263_s8 = sld [smem:[#allocation24_spill]] }
 0x2b5   : > { %v1357_v30 = vpop.f32.mrf.mxu0 }
 0x2b6   : > { %v1361_v31 = vsel %vm791_vm2, %v1357_v30, -inf }
 0x2b7   : > { %v2999_v32 = vpop.f32.mrf.mxu0  ;;  %1362 = vmax.xlane.f32.xlu1 %v1361_v31  ;;  %v1559_v31 = vld [vmem:[%s4188_s6 + $0x10] sm:$0xff] }
 0x2b8   : > { %v1558_v32 = vld [vmem:[%s4188_s6 + $0x8] sm:$0xff] }
 0x2ba   : > { %p4266_p9 = scmp.ne.s32.totalorder %s4263_s8, 0 }
 0x2c8   : > { %1042 = vrot.lane.b32.xlu1 %v3883_v12, %s3520_s29  ;;  %s4217_s29 = smov 16  }
 0x334   : > { %v868_v33 = vpop.xlane.xlu1 %867 }
 0x335   : > { %v869_v34 = vsub.f32 %v862_v21, %v868_v33  ;;  %v1557_v33 = vld [vmem:[%s4188_s6] sm:$0xff] }
 0x337   : > { %v870_v35 = vmul.f32 1.442695, %v869_v34  ;;  %v2851_v34 = vld [vmem:[#allocation7] ss:$0 sm:$0xff] }
 0x338   : > { %v1033_v36 = vpop.xlane.xlu0 %1032 }
 0x339   : > { %3229 = vpow2.f32 %v870_v35  ;;  %v1034_v37 = vsub.f32 %v1027_v24, %v1033_v36  ;;  %v1644_v24 = vld [vmem:[#allocation8 + $0x18] sm:$0xff] }
 0x33b   : > { %v1035_v38 = vmul.f32 1.442695, %v1034_v37  ;;  %v2853_v37 = vld [vmem:[%s4198_s16 + $0x1] ss:$0 sm:$0xff] }
 0x33c   : > { %v1198_v48 = vpop.xlane.xlu0 %1197 }
 0x33d   : > { %3231 = vpow2.f32 %v1035_v38  ;;  %v1199_v49 = vsub.f32 %v1192_v27, %v1198_v48  ;;  %v1642_v27 = vld [vmem:[#allocation8 + $0x8] sm:$0xff] }
 0x33f   : > { %v1200_v50 = vmul.f32 1.442695, %v1199_v49 }
 0x340   : > { %v1363_v39 = vpop.xlane.xlu1 %1362 }
 0x341   : > { %v1364_v40 = vsub.f32 %v1357_v30, %v1363_v39  ;;  %v1560_v30 = vld [vmem:[%s4188_s6 + $0x18] sm:$0xff] }
 0x343   : > { %v1365_v41 = vmul.f32 1.442695, %v1364_v40  ;;  %v2854_v40 = vld [vmem:[%s4199_s17 + $0x1] ss:$0 sm:$0xff] }
 0x344   : > { %v1043_v53 = vpop.permute.xlu1 %1042 }
 0x345   : > { %3233 = vpow2.f32 %v1365_v41 }
 0x346   : > { %v3230_v42 = vpop.eup %3229  ;;  %3235 = vpow2.f32 %v1200_v50 }
 0x347   : > { %v872_v43 = vsel %vm791_vm2, %v3230_v42, 0.0 }
 0x348   : > { %873 = vadd.xlane.f32.xlu0 %v872_v43 }
 0x34a   : > { %v3232_v44 = vpop.eup %3231 }
 0x34b   : > { %v1037_v45 = vsel %vm791_vm2, %v3232_v44, 0.0 }
 0x34c   : > { %1038 = vadd.xlane.f32.xlu1 %v1037_v45 }
 0x352   : > { %v3234_v46 = vpop.eup %3233 }
 0x353   : > { %v1367_v47 = vsel %vm791_vm2, %v3234_v46, 0.0  ;;  %v3236_v51 = vpop.eup %3235 }
 0x354   : > { %1368 = vadd.xlane.f32.xlu1 %v1367_v47  ;;  %v1202_v52 = vsel %vm791_vm2, %v3236_v51, 0.0  ;;  %v2855_v47 = vld [vmem:[%s4189_s7] ss:$0 sm:$0xff] }
 0x35e   : > { %877 = vrot.lane.b32.xlu0 %v3883_v12, %s3521_s0  ;;  %s4216_s0 = smov 24  }
 0x365   : > { %1207 = vrot.lane.b32.xlu1 %v3883_v12, %s3522_s23 }
 0x37d   : > { %1203 = vadd.xlane.f32.xlu0 %v1202_v52 }
 0x393   : > { %1372 = vrot.lane.b32.xlu0 %v3883_v12, %s3523_s24  ;;  %v785_v12 = vld [vmem:[%s4186_s4 + $0x10] sm:$0xff]  ;;  %s4265_s24 = sld [smem:[#allocation36_spill]] }
 0x394   : > { %3008 = vmatpush3.msra.mxu0 %v785_v12 }
 0x395   : > { %3009 = vmatprep.subr.mxu0 %v3511_v0 }
 0x396   : > { %3010 = vmatpush3.msra.mxu0 %v784_v13 }
 0x397   : > { %3011 = vmatprep.subr.mxu0 %v3511_v0 }
 0x398   : > { %3012 = vmatpush3.msra.mxu0 %v783_v14 }
 0x399   : > { %3027 = vmatprep.subr.mxu0 %v3511_v0 }
 0x3d1   : > { %v874_v54 = vpop.xlane.xlu0 %873 }
 0x3d2   : > { %3237 = vrcp.f32 %v874_v54 }
 0x3d5   : > { %v878_v55 = vpop.permute.xlu0 %877  ;;  %v1039_v56 = vpop.xlane.xlu1 %1038 }
 0x3d6   : > { %3239 = vrcp.f32 %v1039_v56  ;;  %2971 = vmatpush3.msra.mxu1 %v878_v55 }
 0x3d7   : > { %2980 = vmatprep.subr.mxu1 %v3511_v0 }
 0x3dd   : > { %v1369_v58 = vpop.xlane.xlu1 %1368 }
 0x3df   : > { %v3238_v57 = vpop.eup %3237 }
 0x3e0   : > { %v876_v59 = vmul.f32 %v3238_v57, %v3230_v42  ;;  %v2857_v42 = vld [vmem:[%s4191_s9] ss:$0 sm:$0xff] }
 0x3e1   : > { %v1208_v62 = vpop.permute.xlu1 %1207 }
 0x3e2   : > { %2973 = vmatmul.mubr.msk.f32.vlgmr.msra.gmra.mxu1 %vm791_vm2, %v876_v59 }
 0x3e3   : > { %v3240_v60 = vpop.eup %3239  ;;  %2981 = vmatpush3.msra.mxu1 %v1043_v53  ;;  %2982 = vmatprep.mubr.msk.f32.mxu1 %vm3512_vm0, %v3511_v0 }
 0x3e4   : > { %2990 = vmatprep.subr.mxu1 %v3511_v0  ;;  %v1041_v61 = vmul.f32 %v3240_v60, %v3232_v44 }
 0x3e6   : > { %2983 = vmatmul.mubr.msk.f32.vlgmr.msra.gmra.mxu1 %vm791_vm2, %v1041_v61 }
 0x3e7   : > { %2991 = vmatpush3.msra.mxu1 %v1208_v62  ;;  %2992 = vmatprep.mubr.msk.f32.mxu1 %vm3512_vm0, %v3511_v0 }
 0x3e8   : > { %3000 = vmatprep.subr.mxu1 %v3511_v0 }
 0x406   : > { %v1204_v63 = vpop.xlane.xlu0 %1203 }
 0x407   : > { %3241 = vrcp.f32 %v1204_v63 }
 0x408   : > { %3243 = vrcp.f32 %v1369_v58 }
 0x40a   : > { %v1373_v4 = vpop.permute.xlu0 %1372 }
 0x414   : > { %v3242_v1 = vpop.eup %3241 }
 0x415   : > { %v1206_v2 = vmul.f32 %v3242_v1, %v3236_v51  ;;  %v3244_v3 = vpop.eup %3243 }
 0x416   : > { %v1371_v5 = vmul.f32 %v3244_v3, %v3234_v46 }
 0x417   : > { %2993 = vmatmul.mubr.msk.f32.vlgmr.msra.gmra.mxu1 %vm791_vm2, %v1206_v2 }
 0x418   : > { %3001 = vmatpush3.msra.mxu1 %v1373_v4  ;;  %3002 = vmatprep.mubr.msk.f32.mxu1 %vm3512_vm0, %v3511_v0 }
 0x419   : > { %3016 = vmatprep.subr.mxu1 %v3511_v0 }
 0x41b   : > { %3003 = vmatmul.mubr.msk.f32.vlgmr.msra.gmra.mxu1 %vm791_vm2, %v1371_v5 }
 0x41c   : > { %3024 = vmatprep.mubr.msk.f32.mxu1 %vm3512_vm0, %v3511_v0  ;;  %3017 = vmatpush3.msra.mxu1 %v1560_v30 }
 0x41d   : > { %3018 = vmatprep.subr.mxu1 %v3511_v0 }
 0x41e   : > { %3019 = vmatpush3.msra.mxu1 %v1559_v31 }
 0x41f   : > { %3020 = vmatprep.subr.mxu1 %v3511_v0 }
 0x420   : > { %3021 = vmatpush3.msra.mxu1 %v1558_v32 }
 0x421   : > { %3022 = vmatprep.subr.mxu1 %v3511_v0 }
 0x422   : > { %3023 = vmatpush3.msra.mxu1 %v1557_v33 }
 0x423   : > { %3038 = vmatprep.subr.mxu1 %v3511_v0 }
 0x4a2   : > { %v949_v7 = vpop.f32.mrf.mxu1 }
 0x4a4   : > { %v2974_v8 = vpop.f32.mrf.mxu1 }
 0x4a6   : > { %v1114_v10 = vpop.f32.mrf.mxu1 }
 0x4a7   : > { %1449 = vrot.lane.b32.xlu1 %v1114_v10, %s4218_s2 }
 0x4a8   : > { %v2984_v11 = vpop.f32.mrf.mxu1 }
 0x4d7   : > { %v1279_v15 = vpop.f32.mrf.mxu1 }
 0x4d8   : > { %1453 = vrot.lane.b32.xlu0 %v1279_v15, %s4217_s29  ;;  %s3527_s29 = smov [#allocation13]  }
 0x4d9   : > { %v2994_v16 = vpop.f32.mrf.mxu1 }
 0x4db   : > { %v1444_v17 = vpop.f32.mrf.mxu1 }
 0x4dc   : > { %1457 = vrot.lane.b32.xlu1 %v1444_v17, %s4216_s0 }
 0x4dd   : > { %v3004_v18 = vpop.f32.mrf.mxu1 }
 0x519   : > { %v1450_v19 = vpop.permute.xlu1 %1449 }
 0x51a   : > { %v1460_v21 = vsel %vm791_vm2, %v949_v7, %v1450_v19 }
 0x54a   : > { %v1454_v20 = vpop.permute.xlu0 %1453 }
 0x54b   : > { %v1462_v22 = vsel %vm1461_vm3, %v1460_v21, %v1454_v20 }
 0x54e   : > { %v1458_v23 = vpop.permute.xlu1 %1457 }
 0x54f   : > { %v1464_v25 = vsel %vm1463_vm4, %v1462_v22, %v1458_v23 }
 0x550   : > { %3014 = vmatmul.mubr.msk.f32.vlgmr.msra.gmra.mxu0 %vm709_vm1, %v1464_v25 }
 0x551   : > { %3028 = vmatpush3.msra.mxu0 %v1644_v24  ;;  %3035 = vmatprep.mubr.msk.f32.mxu0 %vm3512_vm0, %v3511_v0 }
 0x552   : > { %3029 = vmatprep.subr.mxu0 %v3511_v0 }
 0x553   : > { %3030 = vmatpush3.msra.mxu0 %v1643_v26 }
 0x554   : > { %3031 = vmatprep.subr.mxu0 %v3511_v0 }
 0x555   : > { %3032 = vmatpush3.msra.mxu0 %v1642_v27 }
 0x556   : > { %3033 = vmatprep.subr.mxu0 %v3511_v0 }
 0x557   : > { %3034 = vmatpush3.msra.mxu0 %v1641_v28 }
 0x558   : > { %3036 = vmatmul.mubr.msk.f32.vlgmr.msra.gmra.mxu0 %vm709_vm1, %v685_v29  ;;  %3048 = vmatprep.subr.mxu0 %v3511_v0 }
 0x559   : > { %3050 = vmatprep.mubr.msk.f32.mxu0 %vm3512_vm0, %v3511_v0 }
 0x610   : > { %v1540_v35 = vpop.f32.mrf.mxu0 }
 0x611   : > { %v1541_v36 = vadd.f32 %v2851_v34, %v1540_v35 }
 0x612   : > { %v3015_v38 = vpop.f32.mrf.mxu0 }
 0x613   : > { %v1544_v39 = vadd.f32 %v1541_v36, %v3872_v9 }
 0x615   : > { %v1550_v41 = vmul.f32 %v2853_v37, %v1544_v39 }
 0x617   : > { %v4008_v43 = vadd.f32 %v2854_v40, %v1550_v41 }
 0x618   : > { %v1721_v44 = vpop.f32.mrf.mxu0 }
 0x619   : > { %3025 = vmatmul.mubr.msk.f32.vlgmr.msra.gmra.mxu1 %vm709_vm1, %v4008_v43  ;;  %v4012_v45 = vadd.f32 %v2857_v42, %v1721_v44 }
 0x61a   : > { %v3037_v46 = vpop.f32.mrf.mxu0  ;;  %3040 = vmatprep.mubr.msk.f32.mxu1 %vm3512_vm0, %v3511_v0 }
 0x61b   : > { %1895 = vrot.lane.b32.xlu0 %v4012_v45, %s3513_s25  ;;  %3039 = vmatpush3.xpose.msk.msra.mxu1 %vm791_vm2, %v4012_v45  ;;  %v1727_v46 = vld [vmem:[#allocation10 + $0x10] sm:$0xff] }
 0x61c   : > { %3043 = vmatprep.subr.mxu1 %v3511_v0 }
 0x61f   : > { %2060 = vrot.lane.b32.xlu0 %v4012_v45, %s3518_s21 }
 0x623   : > { %2225 = vrot.lane.b32.xlu0 %v4012_v45, %s3519_s15 }
 0x68d   : > { %v1896_v9 = vpop.permute.xlu0 %1895 }
 0x68e   : > { %3049 = vmatpush3.xpose.msk.msra.mxu0 %vm791_vm2, %v1896_v9  ;;  %v1726_v9 = vld [vmem:[#allocation10 + $0x8] sm:$0xff] }
 0x68f   : > { %3058 = vmatprep.subr.mxu0 %v3511_v0 }
 0x691   : > { %v2061_v51 = vpop.permute.xlu0 %2060 }
 0x695   : > { %v2226_v54 = vpop.permute.xlu0 %2225 }
 0x6d9   : > { %v1637_v48 = vpop.f32.mrf.mxu1 }
 0x6da   : > { %v1638_v49 = vadd.f32 %v2855_v47, %v1637_v48  ;;  %v1725_v47 = vld [vmem:[#allocation10] sm:$0xff] }
 0x6db   : > { %v3026_v50 = vpop.f32.mrf.mxu1 }
 0x6dc   : > { %1893 = vrot.lane.b32.xlu1 %v1638_v49, %s3513_s25  ;;  %3041 = vmatmul.mubr.msk.f32.vlgmr.msra.gmra.mxu1 %vm791_vm2, %v1638_v49  ;;  %s4258_s25 = smov 8  }
 0x6dd   : > { %3045 = vmatprep.mubr.msk.f32.mxu1 %vm3512_vm0, %v3511_v0 }
 0x6e0   : > { %2058 = vrot.lane.b32.xlu1 %v1638_v49, %s3518_s21 }
 0x6e4   : > { %2223 = vrot.lane.b32.xlu1 %v1638_v49, %s3519_s15 }
 0x74e   : > { %v1894_v52 = vpop.permute.xlu1 %1893 }
 0x74f   : > { %3051 = vmatmul.mubr.msk.f32.vlgmr.msra.gmra.mxu0 %vm791_vm2, %v1894_v52 }
 0x750   : > { %3059 = vmatpush3.xpose.msk.msra.mxu0 %vm791_vm2, %v2061_v51  ;;  %3060 = vmatprep.mubr.msk.f32.mxu0 %vm3512_vm0, %v3511_v0 }
 0x751   : > { %3068 = vmatprep.subr.mxu0 %v3511_v0 }
 0x752   : > { %v2059_v53 = vpop.permute.xlu1 %2058 }
 0x753   : > { %3061 = vmatmul.mubr.msk.f32.vlgmr.msra.gmra.mxu0 %vm791_vm2, %v2059_v53 }
 0x754   : > { %3069 = vmatpush3.xpose.msk.msra.mxu0 %vm791_vm2, %v2226_v54  ;;  %3070 = vmatprep.mubr.msk.f32.mxu0 %vm3512_vm0, %v3511_v0 }
 0x755   : > { %3078 = vmatprep.subr.mxu0 %v3511_v0 }
 0x756   : > { %v2224_v55 = vpop.permute.xlu1 %2223 }
 0x757   : > { %3071 = vmatmul.mubr.msk.f32.vlgmr.msra.gmra.mxu0 %vm791_vm2, %v2224_v55 }
 0x758   : > { %3086 = vmatprep.mubr.msk.f32.mxu0 %vm3512_vm0, %v3511_v0 }
 0x79c   : > { %v1802_v56 = vpop.f32.mrf.mxu1 }
 0x79d   : > { %v1806_v57 = vsel %vm791_vm2, %v1802_v56, -inf }
 0x79e   : > { %1807 = vmax.xlane.f32.xlu0 %v1806_v57  ;;  %v3042_v58 = vpop.f32.mrf.mxu1 }
 0x80f   : > { %v1967_v59 = vpop.f32.mrf.mxu0 }
 0x810   : > { %v1971_v60 = vsel %vm791_vm2, %v1967_v59, -inf }
 0x811   : > { %1972 = vmax.xlane.f32.xlu1 %v1971_v60  ;;  %v3052_v61 = vpop.f32.mrf.mxu0  ;;  %v2498_v60 = vld [vmem:[#allocation11 + $0x18] sm:$0xff] }
 0x812   : > { %v2497_v61 = vld [vmem:[#allocation11 + $0x10] sm:$0xff] }
 0x813   : > { %v2132_v62 = vpop.f32.mrf.mxu0 }
 0x814   : > { %v2136_v63 = vsel %vm791_vm2, %v2132_v62, -inf }
 0x815   : > { %v3062_v1 = vpop.f32.mrf.mxu0  ;;  %2137 = vmax.xlane.f32.xlu0 %v2136_v63  ;;  %v2495_v63 = vld [vmem:[#allocation11] sm:$0xff] }
 0x816   : > { %v2587_v1 = vld [vmem:[%s4196_s14 + $0x38] sm:$0xff] }
 0x817   : > { %v2297_v2 = vpop.f32.mrf.mxu0 }
 0x818   : > { %v2301_v3 = vsel %vm791_vm2, %v2297_v2, -inf }
 0x819   : > { %v3072_v4 = vpop.f32.mrf.mxu0  ;;  %2302 = vmax.xlane.f32.xlu0 %v2301_v3  ;;  %v2585_v3 = vld [vmem:[%s4196_s14 + $0x28] sm:$0xff] }
 0x81a   : > { %v2584_v4 = vld [vmem:[%s4196_s14 + $0x20] sm:$0xff] }
 0x822   : > { %1817 = vrot.lane.b32.xlu1 %v4012_v45, %s3514_s13  ;;  %s4259_s13 = smov 16  }
 0x827   : > { %v1808_v5 = vpop.xlane.xlu0 %1807 }
 0x828   : > { %v1809_v6 = vsub.f32 %v1802_v56, %v1808_v5  ;;  %v2583_v5 = vld [vmem:[%s4196_s14 + $0x18] sm:$0xff] }
 0x82a   : > { %v1810_v7 = vmul.f32 1.442695, %v1809_v6 }
 0x82c   : > { %3245 = vpow2.f32 %v1810_v7 }
 0x839   : > { %v3246_v8 = vpop.eup %3245 }
 0x83a   : > { %v1812_v10 = vsel %vm791_vm2, %v3246_v8, 0.0 }
 0x846   : > { %1813 = vadd.xlane.f32.xlu1 %v1812_v10  ;;  %v2873_v10 = vld [vmem:[%s4198_s16 + $0x2] ss:$0 sm:$0xff] }
 0x89a   : > { %v1973_v11 = vpop.xlane.xlu1 %1972 }
 0x89b   : > { %v1974_v12 = vsub.f32 %v1967_v59, %v1973_v11 }
 0x89d   : > { %v1975_v13 = vmul.f32 1.442695, %v1974_v12 }
 0x89e   : > { %v1818_v14 = vpop.permute.xlu1 %1817  ;;  %v2138_v15 = vpop.xlane.xlu0 %2137 }
 0x89f   : > { %3247 = vpow2.f32 %v1975_v13  ;;  %v2139_v16 = vsub.f32 %v2132_v62, %v2138_v15  ;;  %3044 = vmatpush3.msra.mxu1 %v1818_v14  ;;  %v2496_v62 = vld [vmem:[#allocation11 + $0x8] sm:$0xff]  ;;  %v2874_v13 = vld [vmem:[%s4199_s17 + $0x2] ss:$0 sm:$0xff] }
 0x8a0   : > { %3053 = vmatprep.subr.mxu1 %v3511_v0 }
 0x8a1   : > { %v2140_v17 = vmul.f32 1.442695, %v2139_v16  ;;  %v2582_v16 = vld [vmem:[%s4196_s14 + $0x10] sm:$0xff] }
 0x8a2   : > { %v2303_v18 = vpop.xlane.xlu0 %2302 }
 0x8a3   : > { %3249 = vpow2.f32 %v2140_v17  ;;  %v2304_v19 = vsub.f32 %v2297_v2, %v2303_v18  ;;  %v2586_v2 = vld [vmem:[%s4196_s14 + $0x30] sm:$0xff]  ;;  %v2580_v17 = vld [vmem:[%s4196_s14] sm:$0xff] }
 0x8a4   : > { %v2875_v18 = vld [vmem:[%s4262_s20] ss:$0 sm:$0xff] }
 0x8a5   : > { %v2305_v20 = vmul.f32 1.442695, %v2304_v19 }
 0x8a7   : > { %3251 = vpow2.f32 %v2305_v20 }
 0x8ac   : > { %v3248_v21 = vpop.eup %3247 }
 0x8ad   : > { %v1977_v22 = vsel %vm791_vm2, %v3248_v21, 0.0 }
 0x8ae   : > { %1978 = vadd.xlane.f32.xlu0 %v1977_v22 }
 0x8b0   : > { %v3250_v23 = vpop.eup %3249 }
 0x8b1   : > { %v2142_v24 = vsel %vm791_vm2, %v3250_v23, 0.0 }
 0x8b2   : > { %2143 = vadd.xlane.f32.xlu1 %v2142_v24 }
 0x8b4   : > { %v3252_v25 = vpop.eup %3251 }
 0x8b5   : > { %v2307_v26 = vsel %vm791_vm2, %v3252_v25, 0.0 }
 0x8b6   : > { %2308 = vadd.xlane.f32.xlu0 %v2307_v26 }
 0x8c3   : > { %2147 = vrot.lane.b32.xlu1 %v4012_v45, %s3515_s19  ;;  %s4260_s19 = smov 24  }
 0x8c7   : > { %2312 = vrot.lane.b32.xlu1 %v4012_v45, %s3517_s22  ;;  %s683_s22 = scalar_lea.vmem [#allocation13], %s3820_s11 }
 0x8c8   : > { %s2685_s21 = sshll.u32 %s683_s22, 4  ;;  %s2686_s21 = int_to_ptr.vmem [resolvable:$true] %s2685_s21 }
 0x8c9   : > { %s3421_s2 = scalar_lea.vmem %s2686_s21, 128 }
 0x8ca   : > { %p3422_p2 = scmp.ne.s32.totalorder %s2686_s21, %s3421_s2 }
 0x8cc   : > { %1982 = vrot.lane.b32.xlu0 %v4012_v45, %s3516_s5  ;;  %v1728_v45 = vld [vmem:[#allocation10 + $0x18] sm:$0xff]  ;;  %s2880_s5 = sshll.u32 %s3644_s1, 7  ;;  %p3423_p11 = pnand %p3422_p2, %p4266_p9 }
 0x8cd   : > { %3079 = vmatpush3.msra.mxu0 %v1728_v45  ;;  %s2683_s0 = scalar_lea.hbm %s4265_s24, %s2880_s5  ;;  %s3425_s1 = sshll.u32 %s3527_s29, 4  ;;  %s3426_s1 = int_to_ptr.vmem [resolvable:$false] %s3425_s1 }
 0x8ce   : > { %3080 = vmatprep.subr.mxu0 %v3511_v0  ;;  %p3424_p13 = pneg %p3423_p11  ;;  %s3427_s11 = scalar_lea.vmem %s3426_s1, 256 }
 0x8cf   : > { %v1814_v27 = vpop.xlane.xlu1 %1813  ;;  %3081 = vmatpush3.msra.mxu0 %v1727_v46  ;;  %p3428_p1 = scmp.lt.s32.totalorder %s2686_s21, %s3426_s1  ;;  %p3429_p4 = scmp.lt.s32.totalorder %s3427_s11, %s3421_s2 }
 0x8d0   : > { %3253 = vrcp.f32 %v1814_v27  ;;  %3082 = vmatprep.subr.mxu0 %v3511_v0 }
 0x8d1   : > { %3083 = vmatpush3.msra.mxu0 %v1726_v9  ;;  %p3430_p6 = por %p3429_p4, %p3428_p1 }
 0x8d2   : > { %3084 = vmatprep.subr.mxu0 %v3511_v0 }
 0x8d3   : > { %3085 = vmatpush3.msra.mxu0 %v1725_v47  ;;  %p3431_p10 = pnand %p3430_p6, %p3424_p13 }
 0x8d4   : > { %3100 = vmatprep.subr.mxu0 %v3511_v0 }
 0x8dd   : > { %v3254_v28 = vpop.eup %3253 }
 0x8de   : > { %v1816_v29 = vmul.f32 %v3254_v28, %v3246_v8 }
 0x8e0   : > { %3046 = vmatmul.mubr.msk.f32.vlgmr.msra.gmra.mxu1 %vm791_vm2, %v1816_v29 }
 0x8e1   : > { %3055 = vmatprep.mubr.msk.f32.mxu1 %vm3512_vm0, %v3511_v0 }
 0x937   : > { %v1979_v30 = vpop.xlane.xlu0 %1978 }
 0x938   : > { %3255 = vrcp.f32 %v1979_v30 }
 0x93b   : > { %v2144_v31 = vpop.xlane.xlu1 %2143 }
 0x93c   : > { %3257 = vrcp.f32 %v2144_v31 }
 0x93f   : > { %v2309_v32 = vpop.xlane.xlu0 %2308  ;;  %v2148_v35 = vpop.permute.xlu1 %2147 }
 0x940   : > { %3259 = vrcp.f32 %v2309_v32 }
 0x943   : > { %v1983_v33 = vpop.permute.xlu0 %1982  ;;  %v2313_v39 = vpop.permute.xlu1 %2312 }
 0x944   : > { %3054 = vmatpush3.msra.mxu1 %v1983_v33 }
 0x945   : > { %v3256_v34 = vpop.eup %3255  ;;  %3063 = vmatprep.subr.mxu1 %v3511_v0 }
 0x946   : > { %v1981_v36 = vmul.f32 %v3256_v34, %v3248_v21 }
 0x948   : > { %3056 = vmatmul.mubr.msk.f32.vlgmr.msra.gmra.mxu1 %vm791_vm2, %v1981_v36 }
 0x949   : > { %v3258_v37 = vpop.eup %3257  ;;  %3064 = vmatpush3.msra.mxu1 %v2148_v35  ;;  %3065 = vmatprep.mubr.msk.f32.mxu1 %vm3512_vm0, %v3511_v0 }
 0x94a   : > { %3073 = vmatprep.subr.mxu1 %v3511_v0  ;;  %v2146_v38 = vmul.f32 %v3258_v37, %v3250_v23 }
 0x94c   : > { %3066 = vmatmul.mubr.msk.f32.vlgmr.msra.gmra.mxu1 %vm791_vm2, %v2146_v38 }
 0x94d   : > { %v3260_v40 = vpop.eup %3259  ;;  %3074 = vmatpush3.msra.mxu1 %v2313_v39  ;;  %3075 = vmatprep.mubr.msk.f32.mxu1 %vm3512_vm0, %v3511_v0 }
 0x94e   : > { %v2311_v41 = vmul.f32 %v3260_v40, %v3252_v25  ;;  %3089 = vmatprep.subr.mxu1 %v3511_v0 }
 0x950   : > { %3076 = vmatmul.mubr.msk.f32.vlgmr.msra.gmra.mxu1 %vm791_vm2, %v2311_v41 }
 0x951   : > { %3097 = vmatprep.mubr.msk.f32.mxu1 %vm3512_vm0, %v3511_v0  ;;  %3090 = vmatpush3.msra.mxu1 %v2498_v60 }
 0x952   : > { %3091 = vmatprep.subr.mxu1 %v3511_v0 }
 0x953   : > { %3092 = vmatpush3.msra.mxu1 %v2497_v61 }
 0x954   : > { %3093 = vmatprep.subr.mxu1 %v3511_v0 }
 0x955   : > { %3094 = vmatpush3.msra.mxu1 %v2496_v62 }
 0x956   : > { %3095 = vmatprep.subr.mxu1 %v3511_v0 }
 0x957   : > { %3096 = vmatpush3.msra.mxu1 %v2495_v63 }
 0x9a0   : > { %v1889_v42 = vpop.f32.mrf.mxu1 }
 0x9a2   : > { %v3047_v44 = vpop.f32.mrf.mxu1 }
 0xa08   : > { %v2054_v48 = vpop.f32.mrf.mxu1 }
 0xa09   : > { %2389 = vrot.lane.b32.xlu0 %v2054_v48, %s4258_s25  ;;  %s4261_s25 = sld [smem:[#allocation32_spill]] }
 0xa0a   : > { %v3057_v49 = vpop.f32.mrf.mxu1 }
 0xa0c   : > { %v2219_v50 = vpop.f32.mrf.mxu1 }
 0xa0d   : > { %2393 = vrot.lane.b32.xlu1 %v2219_v50, %s4259_s13 }
 0xa0e   : > { %v3067_v51 = vpop.f32.mrf.mxu1 }
 0xa0f   : > { %v2871_v6 = vld [vmem:[%s4261_s25] ss:$0 sm:$0xff] }
 0xa10   : > { %v2384_v52 = vpop.f32.mrf.mxu1 }
 0xa11   : > { %2397 = vrot.lane.b32.xlu0 %v2384_v52, %s4260_s19  ;;  %s4264_s19 = sld [smem:[#allocation35_spill]] }
 0xa12   : > { %v3077_v53 = vpop.f32.mrf.mxu1 }
 0xa17   : > { %v2877_v23 = vld [vmem:[%s4264_s19] ss:$0 sm:$0xff] }
 0xa7b   : > { %v2390_v54 = vpop.permute.xlu0 %2389 }
 0xa7c   : > { %v2400_v56 = vsel %vm791_vm2, %v1889_v42, %v2390_v54 }
 0xa7f   : > { %v2394_v55 = vpop.permute.xlu1 %2393 }
 0xa80   : > { %v2401_v57 = vsel %vm1461_vm3, %v2400_v56, %v2394_v55 }
 0xa83   : > { %v2398_v58 = vpop.permute.xlu0 %2397 }
 0xa84   : > { %v2402_v59 = vsel %vm1463_vm4, %v2401_v57, %v2398_v58 }
 0xa85   : > { %3087 = vmatmul.mubr.msk.f32.vlgmr.msra.gmra.mxu0 %vm709_vm1, %v2402_v59 }
 0xa86   : > { %3116 = vmatprep.mubr.msk.f32.mxu0 %vm3512_vm0, %v3511_v0  ;;  %3101 = vmatpush3.msra.mxu0 %v2587_v1 }
 0xa87   : > { %3102 = vmatprep.subr.mxu0 %v3511_v0 }
 0xa88   : > { %3103 = vmatpush3.msra.mxu0 %v2586_v2 }
 0xa89   : > { %3104 = vmatprep.subr.mxu0 %v3511_v0 }
 0xa8a   : > { %3105 = vmatpush3.msra.mxu0 %v2585_v3 }
 0xa8b   : > { %3106 = vmatprep.subr.mxu0 %v3511_v0 }
 0xa8c   : > { %3107 = vmatpush3.msra.mxu0 %v2584_v4 }
 0xa8d   : > { %3108 = vmatprep.subr.mxu0 %v3511_v0 }
 0xa8e   : > { %3109 = vmatpush3.msra.mxu0 %v2583_v5 }
 0xa8f   : > { %3110 = vmatprep.subr.mxu0 %v3511_v0 }
 0xa90   : > { %3111 = vmatpush3.msra.mxu0 %v2582_v16 }
 0xa91   : > { %3112 = vmatprep.subr.mxu0 %v3511_v0 }
 0xb45   : > { %v2478_v7 = vpop.f32.mrf.mxu0 }
 0xb46   : > { %v2479_v8 = vadd.f32 %v2871_v6, %v2478_v7 }
 0xb47   : > { %v3088_v11 = vpop.f32.mrf.mxu0 }
 0xb48   : > { %v2482_v12 = vadd.f32 %v2479_v8, %v4008_v43  ;;  %v2581_v43 = vld [vmem:[%s4196_s14 + $0x8] sm:$0xff] }
 0xb49   : > { %3113 = vmatpush3.msra.mxu0 %v2581_v43 }
 0xb4a   : > { %v2488_v14 = vmul.f32 %v2873_v10, %v2482_v12  ;;  %3114 = vmatprep.subr.mxu0 %v3511_v0 }
 0xb4b   : > { %3115 = vmatpush3.msra.mxu0 %v2580_v17 }
 0xb4c   : > { %v2494_v15 = vadd.f32 %v2874_v13, %v2488_v14 }
 0xb4e   : > { %3098 = vmatmul.mubr.msk.f32.vlgmr.msra.gmra.mxu1 %vm709_vm1, %v2494_v15 }
 0xc0e   : > { %v2575_v19 = vpop.f32.mrf.mxu1 }
 0xc0f   : > { %v2576_v20 = vadd.f32 %v2875_v18, %v2575_v19 }
 0xc10   : > { %v3099_v21 = vpop.f32.mrf.mxu1 }
 0xc11   : > { %v2579_v22 = vmax.f32 %v2576_v20, 0.0 }
 0xc13   : > { %3117 = vmatmul.mubr.msk.f32.vlgmr.msra.gmra.mxu0 %vm2595_vm5, %v2579_v22 }
 0xcd3   : > { %v2665_v24 = vpop.f32.mrf.mxu0 }
 0xcd4   : > { %v2666_v0 = vadd.f32 %v2877_v23, %v2665_v24 }
 0xcd5   : > { %v3118_v25 = vpop.f32.mrf.mxu0 }
 0xcd6   : > { %v2669_v26 = vadd.f32 %v2666_v0, %v2494_v15 }
 0xcd8   : > { %2670 = vst.msk [vmem:[%s683_s22] sm:$0xff] %vm709_vm1, %v2669_v26 }
 0xcd9   : > { %3434 = shalt.err (!%p3431_p10)
}
 0xcda   : > { %s3435_s20 = scalar_lea.hbm %s2683_s0, 128  ;;  %s3439_s13 = scalar_lea.hbm %s4265_s24, 256 }
 0xcdb   : > { %p3436_p3 = scmp.ne.s32.totalorder %s2683_s0, %s3435_s20  ;;  %p3440_p8 = scmp.lt.s32.totalorder %s2683_s0, %s4265_s24 }
 0xcdc   : > { %p3441_p12 = scmp.lt.s32.totalorder %s3439_s13, %s3435_s20 }
 0xcdd   : > { %p3437_p7 = pnand %p3436_p3, %p4266_p9 }
 0xcde   : > { %p3442_p0 = por %p3441_p12, %p3440_p8 }
 0xcdf   : > { %p3438_p5 = pneg %p3437_p7 }
 0xce1   : > { %p3443_p2 = pnand %p3442_p0, %p3438_p5 }
 0xce3   : > { %3446 = shalt.err (!%p3443_p2)
}
 0xce4   : > { %3139 = dma.vmem_to_hbm [thread:$0]  (%p4266_p9), %s2686_s21, 128, %s2683_s0, %s2672_s27  }
 0xce5 PF: > { %s4267_s22 = sld [smem:[#allocation20_spill]]  ;;  %p4270_p13 = scmp.ge.s32.totalorder %s3501_s30, 2 }
 0xce6   : > { %s4268_s15 = sld [smem:[#allocation25_spill]] }
 0xceb   : > { %s2697_s23 = sand.u32 1, %s4267_s22  }
 0xcec   : > { %p4269_p11 = scmp.ne.s32.totalorder %s4268_s15, 0  ;;  %s2698_s2 = scalar_lea.sflag [#allocation4], %s2697_s23 }
 0xcee   : > { %p3162_p1 = pnand %p4270_p13, %p4269_p11 }
 0xcf0   : > { %p3163_p4 = pneg %p3162_p1 }
 0xcf2   : > { %3484 = dma.done.wait (%p3163_p4), %s2698_s2, 128  }
 0xcf3   : > { %3486 = vsyncadd (%p3163_p4), %s2698_s2, 4294967168  ;;  %s4271_s30 = sld [smem:[#allocation22_spill]]  ;;  %s4274_s27 = smov %s3493_s28 }
 0xcf4   : > { %s4272_s29 = sld [smem:[#allocation21_spill]] }
 0xcf5   : > { %s4273_s1 = sld [smem:[#allocation23_spill]] }
 0xcf9   : > { %p36_p6 = scmp.ge.s32.totalorder %s4271_s30, 4  }
 0xcfa   : > { %s4275_s28 = smov %s4272_s29 }
 0xcfb   : > { %s4276_s29 = smov %s4273_s1  ;;  %38 = sbr.rel (!%p36_p6) target bundleno = 21 (0x15), region = 166 }
 0xd00   :  { %2703 = vsyncpa [#allocation3], 1 }
 0xd01   :  { %2705 = vsyncpa [#allocation3 + $0x1], 1 }
 0xd02   :  { %2706 = vsyncpa [#allocation6], 1 }
 0xd03   :  { %2708 = vsyncpa [#allocation6 + $0x1], 1 }
 0xd04   :  { %2709 = vsyncpa [#allocation9], 1 }
 0xd05   :  { %2710 = vsyncpa [#allocation12], 1 }
 0xd06   :  { %2711 = vsyncpa [#allocation4], 1 }
 0xd07   :  { %2713 = vsyncpa [#allocation4 + $0x1], 1 }

</bundles_post_ra>
